<compile_context>
chip_gen: v7x
topology: tpu7x:2x2x1
jax: 0.10.0
libtpu: 0.0.40
codegen_flags: <defaults>
</compile_context>

<pallas_src>
import functools

import jax
import jax.numpy as jnp
from jax import lax
from jax.experimental import pallas as pl
from jax.experimental.pallas import tpu as pltpu


def _round_up(x, m):
    return ((x + m - 1) // m) * m


def _tensorcores_per_chip():
    """Best effort: v5e/v6e have 1 TensorCore per chip, v7x (and v4/v5p) have 2."""
    try:
        kind = jax.devices()[0].device_kind.lower()
    except Exception:
        return 2
    if "lite" in kind or "v5e" in kind or "v6e" in kind:
        return 1
    return 2


# ----------------------------------------------------------------------------- kernel
def transformer_layer_kernel(num_heads, head_pad, use_bf16,
                             x_ref, wqkv_ref, bqkv_ref, wo_ref, bo_ref, wff_ref,
                             o_ref, qkv_s, acc_s):
    BB, S, CP = x_ref.shape
    H = num_heads
    HP = head_pad
    mm_dtype = jnp.bfloat16 if use_bf16 else jnp.float32

    # BB and H are small & static -> these Python loops unroll into straight-line
    # code.  TODO(synk): switch the head loop to lax.fori_loop(..., unroll=True)
    # with pl.ds(h*HP, HP) offsets once H / S grow enough for the trace to matter.
    for bi in range(BB):
        X = x_ref[bi]                                   # (S, CP) f32, lane-dense
        Xm = X.astype(mm_dtype)

        # Fused QKV projection: outer q/k/v linears, MHA in-projections, biases and
        # the 1/sqrt(hd) query scale are all folded into wqkv/bqkv on the host.
        # Staged into VMEM scratch so the per-head slices below are cheap
        # 128-aligned ref reads and the (S, 3*H*HP) value never stays live in vregs.
        qkv_s[...] = (jnp.dot(Xm, wqkv_ref[...],
                              preferred_element_type=jnp.float32)
                      + bqkv_ref[...])

        # Attention accumulator starts at the two f32 residual terms (out-proj bias
        # + skip connection); every store below is a lane-dense (S, CP) slab.
        acc_s[...] = X + bo_ref[...]

        for h in range(H):
            qh = qkv_s[:, h * HP:(h + 1) * HP]                      # scale pre-folded
            kh = qkv_s[:, (H + h) * HP:(H + h + 1) * HP]
            vh = qkv_s[:, (2 * H + h) * HP:(2 * H + h + 1) * HP]

            # TODO(synk): if the Mosaic lowering of this d-contraction emits a
            # per-head vxpose of kh at larger S, store the K block pre-transposed.
            scores = jnp.einsum('qd,kd->qk',
                                qh.astype(mm_dtype), kh.astype(mm_dtype),
                                preferred_element_type=jnp.float32)
            m = jnp.max(scores, axis=-1, keepdims=True)             # f32 VPU/EUP
            e = jnp.exp(scores - m)
            denom = jnp.sum(e, axis=-1, keepdims=True)

            # Unnormalised P@V; the softmax normalisation is applied to the (S, HP)
            # output instead of the (S, S) probability matrix (fewer VPU multiplies
            # once S > hd).  Approx reciprocal (EUP) only on the bf16 fast path.
            o_h = jnp.dot(e.astype(mm_dtype), vh.astype(mm_dtype),
                          preferred_element_type=jnp.float32)
            o_h = o_h * pl.reciprocal(denom, approx=use_bf16)

            # Output projection folded into the head loop: no narrow per-head
            # scratch stores, no re-read of a concatenated attention slab.
            acc_s[...] += jnp.dot(o_h.astype(mm_dtype),
                                  wo_ref[h * HP:(h + 1) * HP, :],
                                  preferred_element_type=jnp.float32)

        y1 = acc_s[...]                                 # attn + out-proj bias + x
        # Pre-fused FFN (fc2 @ fc1 -- valid only because there is no activation /
        # LayerNorm between fc1 and fc2 in this module) + residual.
        y2 = jnp.dot(y1.astype(mm_dtype), wff_ref[...],
                     preferred_element_type=jnp.float32) + y1
        o_ref[bi] = y2.astype(o_ref.dtype)


# ------------------------------------------------------------------- host-side fusion
def fuse_transformer_layer_params(params, num_heads, use_bf16_matmul=True):
    """One-time algebraic fusion + head/lane padding of the weights.

    Call once per parameter set and reuse: the four C^3 HIGHEST-precision fusions
    must not sit on the per-call path.
    """
    c = params['wq'].shape[0]
    H = num_heads
    hd = c // H
    assert hd * H == c, "embed dim must be divisible by num_heads"
    HP = _round_up(hd, 128)                    # padded per-head width (lane tile)
    CP = _round_up(c, 128)                     # padded embedding width
    scale = 1.0 / (float(hd) ** 0.5)
    hp = lax.Precision.HIGHEST                 # fusion must not lose precision

    wq_f = jnp.dot(params['wq'].T, params['wqi'].T, precision=hp) * scale
    wk_f = jnp.dot(params['wk'].T, params['wki'].T, precision=hp)
    wv_f = jnp.dot(params['wv'].T, params['wvi'].T, precision=hp)
    bq_f, bk_f, bv_f = params['bqi'] * scale, params['bki'], params['bvi']

    def pad_w_heads(w):            # (c, c) -> (CP, H*HP), head-blocked, zero-padded
        w = w.reshape(c, H, hd)
        w = jnp.pad(w, ((0, CP - c), (0, 0), (0, HP - hd)))
        return w.reshape(CP, H * HP)

    def pad_b_heads(b):            # (c,) -> (1, H*HP)
        b = b.reshape(H, hd)
        b = jnp.pad(b, ((0, 0), (0, HP - hd)))
        return b.reshape(1, H * HP)

    wqkv = jnp.concatenate([pad_w_heads(wq_f), pad_w_heads(wk_f), pad_w_heads(wv_f)],
                           axis=1)                                  # (CP, 3*H*HP)
    bqkv = jnp.concatenate([pad_b_heads(bq_f), pad_b_heads(bk_f), pad_b_heads(bv_f)],
                           axis=1)                                  # (1, 3*H*HP)

    woT = params['wo'].T.reshape(H, hd, c)                          # per-head rows
    wo = jnp.pad(woT, ((0, 0), (0, HP - hd), (0, CP - c))).reshape(H * HP, CP)
    bo = jnp.pad(params['bo'], (0, CP - c))[None, :]                # (1, CP)

    # Valid only because the module has no activation/LayerNorm between fc1 and fc2.
    wff = jnp.dot(params['wf1'].T, params['wf2'].T, precision=hp)
    wff = jnp.pad(wff, ((0, CP - c), (0, CP - c)))                  # (CP, CP)

    mm_dtype = jnp.bfloat16 if use_bf16_matmul else jnp.float32
    return {
        'wqkv': wqkv.astype(mm_dtype),
        'bqkv': bqkv.astype(jnp.float32),
        'wo': wo.astype(mm_dtype),
        'bo': bo.astype(jnp.float32),
        'wff': wff.astype(mm_dtype),
    }


# ---------------------------------------------------------------------- kernel driver
@functools.partial(jax.jit, static_argnames=("num_heads",))
def transformer_layer_fused(x_sbc, fused, num_heads):
    """x_sbc: (S, B, C) f32 (PyTorch (seq, batch, embed)); fused: see fuse_...()."""
    S, B, C = x_sbc.shape
    H = num_heads
    CP = fused['wqkv'].shape[0]
    HP = fused['wqkv'].shape[1] // (3 * H)
    use_bf16 = fused['wqkv'].dtype == jnp.bfloat16

    # One block of batches per TensorCore: single step on 1-TC v5e/v6e (the grid is
    # a serial loop there), two 'parallel' blocks on 2-TC v7x.
    grid_b = max(1, min(B, _tensorcores_per_chip()))
    bb = (B + grid_b - 1) // grid_b
    b_pad = grid_b * bb

    x_b = jnp.transpose(x_sbc, (1, 0, 2))                            # (B, S, C)
    x_b = jnp.pad(x_b, ((0, b_pad - B), (0, 0), (0, CP - C)))        # zero-padded lanes

    wqkv, bqkv, wo, bo, wff = (fused['wqkv'], fused['bqkv'], fused['wo'],
                               fused['bo'], fused['wff'])

    # Advisory cost estimate so XLA can schedule around the custom call.
    flops = int(b_pad * (2 * S * CP * (3 * H * HP)
                         + H * (2 * S * S * HP + 2 * S * S * HP + 2 * S * HP * CP)
                         + 2 * S * CP * CP))
    transcendentals = int(b_pad * H * S * S)
    bytes_accessed = int(sum(a.size * a.dtype.itemsize
                             for a in (x_b, wqkv, bqkv, wo, bo, wff))
                         + b_pad * S * CP * 4)

    # VMEM budget: double-buffered operands + scratch + headroom, clamped so we
    # never request v7x's entire 64 MiB per-core VMEM.
    weight_bytes = sum(a.size * a.dtype.itemsize for a in (wqkv, bqkv, wo, bo, wff))
    io_bytes = 2 * bb * S * CP * 4
    scratch_bytes = (S * 3 * H * HP + S * CP) * 4
    vmem_limit = int(min(max(2 * (weight_bytes + io_bytes) + scratch_bytes + (8 << 20),
                             16 << 20),
                         48 << 20))

    out = pl.pallas_call(
        functools.partial(transformer_layer_kernel, H, HP, use_bf16),
        out_shape=jax.ShapeDtypeStruct((b_pad, S, CP), x_sbc.dtype),
        grid_spec=pltpu.PrefetchScalarGridSpec(
            num_scalar_prefetch=0,
            grid=(grid_b,),
            in_specs=[
                pl.BlockSpec((bb, S, CP), lambda b: (b, 0, 0)),       # activations
                # Grid-invariant weights.  TODO(synk): at large C mark these
                # pipeline_mode=pl.Buffered(1) and add an 'arbitrary' column-tiling
                # grid axis so the fused weights never exceed the VMEM budget.
                pl.BlockSpec((CP, 3 * H * HP), lambda b: (0, 0)),     # fused QKV W
                pl.BlockSpec((1, 3 * H * HP), lambda b: (0, 0)),      # fused QKV b
                pl.BlockSpec((H * HP, CP), lambda b: (0, 0)),         # out-proj W (per-head rows)
                pl.BlockSpec((1, CP), lambda b: (0, 0)),              # out-proj b
                pl.BlockSpec((CP, CP), lambda b: (0, 0)),             # fused FFN W
            ],
            out_specs=pl.BlockSpec((bb, S, CP), lambda b: (b, 0, 0)),
            scratch_shapes=[
                pltpu.VMEM((S, 3 * H * HP), jnp.float32),             # staged QKV
                pltpu.VMEM((S, CP), jnp.float32),                     # attn accumulator
            ],
        ),
        compiler_params=pltpu.CompilerParams(
            dimension_semantics=("parallel",),
            vmem_limit_bytes=vmem_limit,
        ),
        cost_estimate=pl.CostEstimate(flops=flops,
                                      transcendentals=transcendentals,
                                      bytes_accessed=bytes_accessed),
    )(x_b, wqkv, bqkv, wo, bo, wff)

    out = out[:B, :, :C]                                  # drop batch / lane padding
    return jnp.transpose(out, (1, 0, 2))                  # back to (S, B, C)


def transformer_layer(x_sbc, params, num_heads, use_bf16_matmul=True):
    """Convenience wrapper (fuses weights on every call; production code should call
    fuse_transformer_layer_params once and reuse it)."""
    fused = fuse_transformer_layer_params(params, num_heads, use_bf16_matmul)
    return transformer_layer_fused(x_sbc, fused, num_heads=num_heads)


# ------------------------------------------------------------------ pure-JAX reference
def transformer_layer_ref(x_sbc, params, num_heads):
    """Pure-JAX reference following the exact (unfused) PyTorch math."""
    S, B, C = x_sbc.shape
    H = num_heads
    hd = C // H
    x = x_sbc  # (S, B, C)

    q = x @ params['wq'].T
    k = x @ params['wk'].T
    v = x @ params['wv'].T

    qp = q @ params['wqi'].T + params['bqi']
    kp = k @ params['wki'].T + params['bki']
    vp = v @ params['wvi'].T + params['bvi']

    def split_heads(t):  # (S, B, C) -> (B*H, S, hd)
        t = t.reshape(S, B, H, hd)
        return jnp.transpose(t, (1, 2, 0, 3)).reshape(B * H, S, hd)

    qh, kh, vh = split_heads(qp), split_heads(kp), split_heads(vp)
    scores = jnp.einsum('nqd,nkd->nqk', qh, kh) / jnp.sqrt(jnp.float32(hd))
    p = jax.nn.softmax(scores, axis=-1)
    o = jnp.einsum('nqk,nkd->nqd', p, vh)                        # (B*H, S, hd)
    o = o.reshape(B, H, S, hd).transpose(2, 0, 1, 3).reshape(S, B, C)
    attn = o @ params['wo'].T + params['bo']

    y1 = attn + x
    y2 = (y1 @ params['wf1'].T) @ params['wf2'].T + y1
    return y2


def init_params(key, c):
    ks = jax.random.split(key, 12)
    s = 1.0 / jnp.sqrt(jnp.float32(c))
    return {
        'wq':  jax.random.normal(ks[0], (c, c), jnp.float32) * s,
        'wk':  jax.random.normal(ks[1], (c, c), jnp.float32) * s,
        'wv':  jax.random.normal(ks[2], (c, c), jnp.float32) * s,
        'wqi': jax.random.normal(ks[3], (c, c), jnp.float32) * s,
        'wki': jax.random.normal(ks[4], (c, c), jnp.float32) * s,
        'wvi': jax.random.normal(ks[5], (c, c), jnp.float32) * s,
        'bqi': jax.random.normal(ks[6], (c,), jnp.float32) * 0.1,
        'bki': jax.random.normal(ks[7], (c,), jnp.float32) * 0.1,
        'bvi': jax.random.normal(ks[8], (c,), jnp.float32) * 0.1,
        'wo':  jax.random.normal(ks[9], (c, c), jnp.float32) * s,
        'bo':  jax.random.normal(ks[10], (c,), jnp.float32) * 0.1,
        'wf1': jax.random.normal(ks[11], (c, c), jnp.float32) * s,
        'wf2': jax.random.normal(jax.random.fold_in(key, 99), (c, c), jnp.float32) * s,
    }


if __name__ == "__main__":
    S, B, C, H = 8, 2, 32, 4   # seq, batch, channels, num_heads (C % H == 0)

    key = jax.random.PRNGKey(0)
    kx, kp = jax.random.split(key)
    x = jax.random.normal(kx, (S, B, C), jnp.float32)
    params = init_params(kp, C)

    ref = transformer_layer_ref(x, params, H)

    # 1) Strict path: f32 MXU operands must reproduce the PyTorch f32 math to 1e-4.
    fused_f32 = fuse_transformer_layer_params(params, H, use_bf16_matmul=False)
    out_f32 = jax.block_until_ready(transformer_layer_fused(x, fused_f32, num_heads=H))
    assert out_f32.shape == (S, B, C)
    if not jnp.allclose(out_f32, ref, rtol=1e-4, atol=1e-4):
        err = float(jnp.max(jnp.abs(out_f32 - ref)))
        raise AssertionError(f"f32 kernel disagrees with reference (max abs err {err})")

    # 2) Fast path: bf16 MXU operands / f32 accumulation (v6e/v7x-native MXU path).
    #    Re-validated per review: checked against the f32 reference within a bf16
    #    error budget (relative Frobenius error; bf16 eps ~ 4e-3 over 5 chained dots).
    fused_bf16 = fuse_transformer_layer_params(params, H, use_bf16_matmul=True)
    out_bf16 = jax.block_until_ready(transformer_layer_fused(x, fused_bf16, num_heads=H))
    assert out_bf16.shape == (S, B, C)
    assert bool(jnp.all(jnp.isfinite(out_bf16)))
    rel_err = float(jnp.linalg.norm(out_bf16 - ref) / jnp.linalg.norm(ref))
    if rel_err > 3e-2:
        raise AssertionError(f"bf16 kernel relative error {rel_err} exceeds bf16 budget")

    print("KERNEL_OK")
</pallas_src>

<mosaic_0001>
module attributes {stable_mosaic.version = 11 : i64} {
  func.func @transformer_layer_kernel(%arg0: i32, %arg1: memref<1x8x128xf32, #tpu.memory_space<vmem>>, %arg2: memref<128x1536xf32, #tpu.memory_space<vmem>>, %arg3: memref<1x1536xf32, #tpu.memory_space<vmem>>, %arg4: memref<512x128xf32, #tpu.memory_space<vmem>>, %arg5: memref<1x128xf32, #tpu.memory_space<vmem>>, %arg6: memref<128x128xf32, #tpu.memory_space<vmem>>, %arg7: memref<1x8x128xf32, #tpu.memory_space<vmem>>, %arg8: memref<8x1536xf32, #tpu.memory_space<vmem>>, %arg9: memref<8x128xf32, #tpu.memory_space<vmem>>) attributes {dimension_semantics = [#tpu.dimension_semantics<parallel>], iteration_bounds = array<i64: 2>, scalar_prefetch = 0 : i64, scratch_operands = 2 : i64, tpu.core_type = #tpu.core_type<tc>, window_params = [{transform_indices = @transform_0, window_bounds = array<i64: 1, 8, 128>}, {pipeline_mode = #tpu.pipeline_mode<synchronous>, transform_indices = @transform_1, window_bounds = array<i64: 128, 1536>}, {pipeline_mode = #tpu.pipeline_mode<synchronous>, transform_indices = @transform_2, window_bounds = array<i64: 1, 1536>}, {pipeline_mode = #tpu.pipeline_mode<synchronous>, transform_indices = @transform_3, window_bounds = array<i64: 512, 128>}, {pipeline_mode = #tpu.pipeline_mode<synchronous>, transform_indices = @transform_4, window_bounds = array<i64: 1, 128>}, {pipeline_mode = #tpu.pipeline_mode<synchronous>, transform_indices = @transform_5, window_bounds = array<i64: 128, 128>}, {transform_indices = @transform_6, window_bounds = array<i64: 1, 8, 128>}]} {
    %c0 = arith.constant 0 : index
    %c0_0 = arith.constant 0 : index
    %c0_1 = arith.constant 0 : index
    %0 = vector.load %arg1[%c0, %c0_0, %c0_1] : memref<1x8x128xf32, #tpu.memory_space<vmem>>, vector<1x8x128xf32>
    %1 = vector.shape_cast %0 : vector<1x8x128xf32> to vector<8x128xf32>
    %c0_2 = arith.constant 0 : index
    %c0_3 = arith.constant 0 : index
    %2 = vector.load %arg2[%c0_2, %c0_3] : memref<128x1536xf32, #tpu.memory_space<vmem>>, vector<128x1536xf32>
    %cst = arith.constant dense<0.000000e+00> : vector<8x1536xf32>
    %3 = tpu.matmul %1, %2, %cst {dimension_numbers = #tpu.dot_dimension_numbers<[1], [0], [0], [1], [0, 0, 1, 1], [], []>} : vector<8x128xf32>, vector<128x1536xf32>, vector<8x1536xf32> -> vector<8x1536xf32>
    %c0_4 = arith.constant 0 : index
    %c0_5 = arith.constant 0 : index
    %4 = vector.load %arg3[%c0_4, %c0_5] : memref<1x1536xf32, #tpu.memory_space<vmem>>, vector<1x1536xf32>
    %5 = vector.broadcast %4 : vector<1x1536xf32> to vector<8x1536xf32>
    %6 = arith.addf %3, %5 : vector<8x1536xf32>
    %c0_6 = arith.constant 0 : index
    %c0_7 = arith.constant 0 : index
    %7 = vector.load %arg8[%c0_6, %c0_7] : memref<8x1536xf32, #tpu.memory_space<vmem>>, vector<8x1536xf32>
    tpu.vector_store %arg8[%c0_6, %c0_7], %6 {strides = array<i32>} : memref<8x1536xf32, #tpu.memory_space<vmem>>, vector<8x1536xf32>,
    %c0_8 = arith.constant 0 : index
    %c0_9 = arith.constant 0 : index
    %8 = vector.load %arg5[%c0_8, %c0_9] : memref<1x128xf32, #tpu.memory_space<vmem>>, vector<1x128xf32>
    %9 = vector.broadcast %8 : vector<1x128xf32> to vector<8x128xf32>
    %10 = arith.addf %1, %9 : vector<8x128xf32>
    %c0_10 = arith.constant 0 : index
    %c0_11 = arith.constant 0 : index
    %11 = vector.load %arg9[%c0_10, %c0_11] : memref<8x128xf32, #tpu.memory_space<vmem>>, vector<8x128xf32>
    tpu.vector_store %arg9[%c0_10, %c0_11], %10 {strides = array<i32>} : memref<8x128xf32, #tpu.memory_space<vmem>>, vector<8x128xf32>,
    %c0_12 = arith.constant 0 : index
    %c0_13 = arith.constant 0 : index
    %12 = vector.load %arg8[%c0_12, %c0_13] : memref<8x1536xf32, #tpu.memory_space<vmem>>, vector<8x128xf32>
    %c0_14 = arith.constant 0 : index
    %c512 = arith.constant 512 : index
    %13 = vector.load %arg8[%c0_14, %c512] : memref<8x1536xf32, #tpu.memory_space<vmem>>, vector<8x128xf32>
    %c0_15 = arith.constant 0 : index
    %c1024 = arith.constant 1024 : index
    %14 = vector.load %arg8[%c0_15, %c1024] : memref<8x1536xf32, #tpu.memory_space<vmem>>, vector<8x128xf32>
    "tpu.trace_start"() <{level = 10 : i32, message = "qd,kd->qk"}> : () -> ()
    %cst_16 = arith.constant dense<0.000000e+00> : vector<8x8xf32>
    %15 = tpu.matmul %12, %13, %cst_16 {dimension_numbers = #tpu.dot_dimension_numbers<[1], [1], [0], [0], [0, 0, 1, 0], [], []>} : vector<8x128xf32>, vector<8x128xf32>, vector<8x8xf32> -> vector<8x8xf32>
    "tpu.trace_stop"() : () -> ()
    %cst_17 = arith.constant dense<0xFF800000> : vector<8xf32>
    %16 = vector.multi_reduction <maximumf>, %15, %cst_17 [1] : vector<8x8xf32> to vector<8xf32>
    %17 = vector.shape_cast %16 : vector<8xf32> to vector<8x1xf32>
    %18 = vector.broadcast %17 : vector<8x1xf32> to vector<8x8xf32>
    %19 = arith.subf %15, %18 : vector<8x8xf32>
    %20 = math.exp %19 : vector<8x8xf32>
    %cst_18 = arith.constant dense<0.000000e+00> : vector<8xf32>
    %21 = vector.multi_reduction <add>, %20, %cst_18 [1] : vector<8x8xf32> to vector<8xf32>
    %22 = vector.shape_cast %21 : vector<8xf32> to vector<8x1xf32>
    %cst_19 = arith.constant dense<0.000000e+00> : vector<8x128xf32>
    %23 = tpu.matmul %20, %14, %cst_19 {dimension_numbers = #tpu.dot_dimension_numbers<[1], [0], [0], [1], [0, 0, 1, 1], [], []>} : vector<8x8xf32>, vector<8x128xf32>, vector<8x128xf32> -> vector<8x128xf32>
    %24 = tpu.reciprocal %22 : vector<8x1xf32> -> vector<8x1xf32>
    %25 = vector.broadcast %24 : vector<8x1xf32> to vector<8x128xf32>
    %26 = arith.mulf %23, %25 : vector<8x128xf32>
    %c0_20 = arith.constant 0 : index
    %c0_21 = arith.constant 0 : index
    %27 = vector.load %arg9[%c0_20, %c0_21] : memref<8x128xf32, #tpu.memory_space<vmem>>, vector<8x128xf32>
    %c0_22 = arith.constant 0 : index
    %c0_23 = arith.constant 0 : index
    %28 = vector.load %arg4[%c0_22, %c0_23] : memref<512x128xf32, #tpu.memory_space<vmem>>, vector<128x128xf32>
    %cst_24 = arith.constant dense<0.000000e+00> : vector<8x128xf32>
    %29 = tpu.matmul %26, %28, %cst_24 {dimension_numbers = #tpu.dot_dimension_numbers<[1], [0], [0], [1], [0, 0, 1, 1], [], []>} : vector<8x128xf32>, vector<128x128xf32>, vector<8x128xf32> -> vector<8x128xf32>
    %30 = arith.addf %27, %29 : vector<8x128xf32>
    %c0_25 = arith.constant 0 : index
    %c0_26 = arith.constant 0 : index
    %31 = vector.load %arg9[%c0_25, %c0_26] : memref<8x128xf32, #tpu.memory_space<vmem>>, vector<8x128xf32>
    tpu.vector_store %arg9[%c0_25, %c0_26], %30 {strides = array<i32>} : memref<8x128xf32, #tpu.memory_space<vmem>>, vector<8x128xf32>,
    %c0_27 = arith.constant 0 : index
    %c128 = arith.constant 128 : index
    %32 = vector.load %arg8[%c0_27, %c128] : memref<8x1536xf32, #tpu.memory_space<vmem>>, vector<8x128xf32>
    %c0_28 = arith.constant 0 : index
    %c640 = arith.constant 640 : index
    %33 = vector.load %arg8[%c0_28, %c640] : memref<8x1536xf32, #tpu.memory_space<vmem>>, vector<8x128xf32>
    %c0_29 = arith.constant 0 : index
    %c1152 = arith.constant 1152 : index
    %34 = vector.load %arg8[%c0_29, %c1152] : memref<8x1536xf32, #tpu.memory_space<vmem>>, vector<8x128xf32>
    "tpu.trace_start"() <{level = 10 : i32, message = "qd,kd->qk"}> : () -> ()
    %cst_30 = arith.constant dense<0.000000e+00> : vector<8x8xf32>
    %35 = tpu.matmul %32, %33, %cst_30 {dimension_numbers = #tpu.dot_dimension_numbers<[1], [1], [0], [0], [0, 0, 1, 0], [], []>} : vector<8x128xf32>, vector<8x128xf32>, vector<8x8xf32> -> vector<8x8xf32>
    "tpu.trace_stop"() : () -> ()
    %cst_31 = arith.constant dense<0xFF800000> : vector<8xf32>
    %36 = vector.multi_reduction <maximumf>, %35, %cst_31 [1] : vector<8x8xf32> to vector<8xf32>
    %37 = vector.shape_cast %36 : vector<8xf32> to vector<8x1xf32>
    %38 = vector.broadcast %37 : vector<8x1xf32> to vector<8x8xf32>
    %39 = arith.subf %35, %38 : vector<8x8xf32>
    %40 = math.exp %39 : vector<8x8xf32>
    %cst_32 = arith.constant dense<0.000000e+00> : vector<8xf32>
    %41 = vector.multi_reduction <add>, %40, %cst_32 [1] : vector<8x8xf32> to vector<8xf32>
    %42 = vector.shape_cast %41 : vector<8xf32> to vector<8x1xf32>
    %cst_33 = arith.constant dense<0.000000e+00> : vector<8x128xf32>
    %43 = tpu.matmul %40, %34, %cst_33 {dimension_numbers = #tpu.dot_dimension_numbers<[1], [0], [0], [1], [0, 0, 1, 1], [], []>} : vector<8x8xf32>, vector<8x128xf32>, vector<8x128xf32> -> vector<8x128xf32>
    %44 = tpu.reciprocal %42 : vector<8x1xf32> -> vector<8x1xf32>
    %45 = vector.broadcast %44 : vector<8x1xf32> to vector<8x128xf32>
    %46 = arith.mulf %43, %45 : vector<8x128xf32>
    %c0_34 = arith.constant 0 : index
    %c0_35 = arith.constant 0 : index
    %47 = vector.load %arg9[%c0_34, %c0_35] : memref<8x128xf32, #tpu.memory_space<vmem>>, vector<8x128xf32>
    %c128_36 = arith.constant 128 : index
    %c0_37 = arith.constant 0 : index
    %48 = vector.load %arg4[%c128_36, %c0_37] : memref<512x128xf32, #tpu.memory_space<vmem>>, vector<128x128xf32>
    %cst_38 = arith.constant dense<0.000000e+00> : vector<8x128xf32>
    %49 = tpu.matmul %46, %48, %cst_38 {dimension_numbers = #tpu.dot_dimension_numbers<[1], [0], [0], [1], [0, 0, 1, 1], [], []>} : vector<8x128xf32>, vector<128x128xf32>, vector<8x128xf32> -> vector<8x128xf32>
    %50 = arith.addf %47, %49 : vector<8x128xf32>
    %c0_39 = arith.constant 0 : index
    %c0_40 = arith.constant 0 : index
    %51 = vector.load %arg9[%c0_39, %c0_40] : memref<8x128xf32, #tpu.memory_space<vmem>>, vector<8x128xf32>
    tpu.vector_store %arg9[%c0_39, %c0_40], %50 {strides = array<i32>} : memref<8x128xf32, #tpu.memory_space<vmem>>, vector<8x128xf32>,
    %c0_41 = arith.constant 0 : index
    %c256 = arith.constant 256 : index
    %52 = vector.load %arg8[%c0_41, %c256] : memref<8x1536xf32, #tpu.memory_space<vmem>>, vector<8x128xf32>
    %c0_42 = arith.constant 0 : index
    %c768 = arith.constant 768 : index
    %53 = vector.load %arg8[%c0_42, %c768] : memref<8x1536xf32, #tpu.memory_space<vmem>>, vector<8x128xf32>
    %c0_43 = arith.constant 0 : index
    %c1280 = arith.constant 1280 : index
    %54 = vector.load %arg8[%c0_43, %c1280] : memref<8x1536xf32, #tpu.memory_space<vmem>>, vector<8x128xf32>
    "tpu.trace_start"() <{level = 10 : i32, message = "qd,kd->qk"}> : () -> ()
    %cst_44 = arith.constant dense<0.000000e+00> : vector<8x8xf32>
    %55 = tpu.matmul %52, %53, %cst_44 {dimension_numbers = #tpu.dot_dimension_numbers<[1], [1], [0], [0], [0, 0, 1, 0], [], []>} : vector<8x128xf32>, vector<8x128xf32>, vector<8x8xf32> -> vector<8x8xf32>
    "tpu.trace_stop"() : () -> ()
    %cst_45 = arith.constant dense<0xFF800000> : vector<8xf32>
    %56 = vector.multi_reduction <maximumf>, %55, %cst_45 [1] : vector<8x8xf32> to vector<8xf32>
    %57 = vector.shape_cast %56 : vector<8xf32> to vector<8x1xf32>
    %58 = vector.broadcast %57 : vector<8x1xf32> to vector<8x8xf32>
    %59 = arith.subf %55, %58 : vector<8x8xf32>
    %60 = math.exp %59 : vector<8x8xf32>
    %cst_46 = arith.constant dense<0.000000e+00> : vector<8xf32>
    %61 = vector.multi_reduction <add>, %60, %cst_46 [1] : vector<8x8xf32> to vector<8xf32>
    %62 = vector.shape_cast %61 : vector<8xf32> to vector<8x1xf32>
    %cst_47 = arith.constant dense<0.000000e+00> : vector<8x128xf32>
    %63 = tpu.matmul %60, %54, %cst_47 {dimension_numbers = #tpu.dot_dimension_numbers<[1], [0], [0], [1], [0, 0, 1, 1], [], []>} : vector<8x8xf32>, vector<8x128xf32>, vector<8x128xf32> -> vector<8x128xf32>
    %64 = tpu.reciprocal %62 : vector<8x1xf32> -> vector<8x1xf32>
    %65 = vector.broadcast %64 : vector<8x1xf32> to vector<8x128xf32>
    %66 = arith.mulf %63, %65 : vector<8x128xf32>
    %c0_48 = arith.constant 0 : index
    %c0_49 = arith.constant 0 : index
    %67 = vector.load %arg9[%c0_48, %c0_49] : memref<8x128xf32, #tpu.memory_space<vmem>>, vector<8x128xf32>
    %c256_50 = arith.constant 256 : index
    %c0_51 = arith.constant 0 : index
    %68 = vector.load %arg4[%c256_50, %c0_51] : memref<512x128xf32, #tpu.memory_space<vmem>>, vector<128x128xf32>
    %cst_52 = arith.constant dense<0.000000e+00> : vector<8x128xf32>
    %69 = tpu.matmul %66, %68, %cst_52 {dimension_numbers = #tpu.dot_dimension_numbers<[1], [0], [0], [1], [0, 0, 1, 1], [], []>} : vector<8x128xf32>, vector<128x128xf32>, vector<8x128xf32> -> vector<8x128xf32>
    %70 = arith.addf %67, %69 : vector<8x128xf32>
    %c0_53 = arith.constant 0 : index
    %c0_54 = arith.constant 0 : index
    %71 = vector.load %arg9[%c0_53, %c0_54] : memref<8x128xf32, #tpu.memory_space<vmem>>, vector<8x128xf32>
    tpu.vector_store %arg9[%c0_53, %c0_54], %70 {strides = array<i32>} : memref<8x128xf32, #tpu.memory_space<vmem>>, vector<8x128xf32>,
    %c0_55 = arith.constant 0 : index
    %c384 = arith.constant 384 : index
    %72 = vector.load %arg8[%c0_55, %c384] : memref<8x1536xf32, #tpu.memory_space<vmem>>, vector<8x128xf32>
    %c0_56 = arith.constant 0 : index
    %c896 = arith.constant 896 : index
    %73 = vector.load %arg8[%c0_56, %c896] : memref<8x1536xf32, #tpu.memory_space<vmem>>, vector<8x128xf32>
    %c0_57 = arith.constant 0 : index
    %c1408 = arith.constant 1408 : index
    %74 = vector.load %arg8[%c0_57, %c1408] : memref<8x1536xf32, #tpu.memory_space<vmem>>, vector<8x128xf32>
    "tpu.trace_start"() <{level = 10 : i32, message = "qd,kd->qk"}> : () -> ()
    %cst_58 = arith.constant dense<0.000000e+00> : vector<8x8xf32>
    %75 = tpu.matmul %72, %73, %cst_58 {dimension_numbers = #tpu.dot_dimension_numbers<[1], [1], [0], [0], [0, 0, 1, 0], [], []>} : vector<8x128xf32>, vector<8x128xf32>, vector<8x8xf32> -> vector<8x8xf32>
    "tpu.trace_stop"() : () -> ()
    %cst_59 = arith.constant dense<0xFF800000> : vector<8xf32>
    %76 = vector.multi_reduction <maximumf>, %75, %cst_59 [1] : vector<8x8xf32> to vector<8xf32>
    %77 = vector.shape_cast %76 : vector<8xf32> to vector<8x1xf32>
    %78 = vector.broadcast %77 : vector<8x1xf32> to vector<8x8xf32>
    %79 = arith.subf %75, %78 : vector<8x8xf32>
    %80 = math.exp %79 : vector<8x8xf32>
    %cst_60 = arith.constant dense<0.000000e+00> : vector<8xf32>
    %81 = vector.multi_reduction <add>, %80, %cst_60 [1] : vector<8x8xf32> to vector<8xf32>
    %82 = vector.shape_cast %81 : vector<8xf32> to vector<8x1xf32>
    %cst_61 = arith.constant dense<0.000000e+00> : vector<8x128xf32>
    %83 = tpu.matmul %80, %74, %cst_61 {dimension_numbers = #tpu.dot_dimension_numbers<[1], [0], [0], [1], [0, 0, 1, 1], [], []>} : vector<8x8xf32>, vector<8x128xf32>, vector<8x128xf32> -> vector<8x128xf32>
    %84 = tpu.reciprocal %82 : vector<8x1xf32> -> vector<8x1xf32>
    %85 = vector.broadcast %84 : vector<8x1xf32> to vector<8x128xf32>
    %86 = arith.mulf %83, %85 : vector<8x128xf32>
    %c0_62 = arith.constant 0 : index
    %c0_63 = arith.constant 0 : index
    %87 = vector.load %arg9[%c0_62, %c0_63] : memref<8x128xf32, #tpu.memory_space<vmem>>, vector<8x128xf32>
    %c384_64 = arith.constant 384 : index
    %c0_65 = arith.constant 0 : index
    %88 = vector.load %arg4[%c384_64, %c0_65] : memref<512x128xf32, #tpu.memory_space<vmem>>, vector<128x128xf32>
    %cst_66 = arith.constant dense<0.000000e+00> : vector<8x128xf32>
    %89 = tpu.matmul %86, %88, %cst_66 {dimension_numbers = #tpu.dot_dimension_numbers<[1], [0], [0], [1], [0, 0, 1, 1], [], []>} : vector<8x128xf32>, vector<128x128xf32>, vector<8x128xf32> -> vector<8x128xf32>
    %90 = arith.addf %87, %89 : vector<8x128xf32>
    %c0_67 = arith.constant 0 : index
    %c0_68 = arith.constant 0 : index
    %91 = vector.load %arg9[%c0_67, %c0_68] : memref<8x128xf32, #tpu.memory_space<vmem>>, vector<8x128xf32>
    tpu.vector_store %arg9[%c0_67, %c0_68], %90 {strides = array<i32>} : memref<8x128xf32, #tpu.memory_space<vmem>>, vector<8x128xf32>,
    %c0_69 = arith.constant 0 : index
    %c0_70 = arith.constant 0 : index
    %92 = vector.load %arg9[%c0_69, %c0_70] : memref<8x128xf32, #tpu.memory_space<vmem>>, vector<8x128xf32>
    %c0_71 = arith.constant 0 : index
    %c0_72 = arith.constant 0 : index
    %93 = vector.load %arg6[%c0_71, %c0_72] : memref<128x128xf32, #tpu.memory_space<vmem>>, vector<128x128xf32>
    %cst_73 = arith.constant dense<0.000000e+00> : vector<8x128xf32>
    %94 = tpu.matmul %92, %93, %cst_73 {dimension_numbers = #tpu.dot_dimension_numbers<[1], [0], [0], [1], [0, 0, 1, 1], [], []>} : vector<8x128xf32>, vector<128x128xf32>, vector<8x128xf32> -> vector<8x128xf32>
    %95 = arith.addf %94, %92 : vector<8x128xf32>
    %c0_74 = arith.constant 0 : index
    %c0_75 = arith.constant 0 : index
    %c0_76 = arith.constant 0 : index
    %96 = vector.load %arg7[%c0_74, %c0_75, %c0_76] : memref<1x8x128xf32, #tpu.memory_space<vmem>>, vector<1x8x128xf32>
    %97 = vector.shape_cast %96 : vector<1x8x128xf32> to vector<8x128xf32>
    %98 = vector.shape_cast %95 : vector<8x128xf32> to vector<1x8x128xf32>
    tpu.vector_store %arg7[%c0_74, %c0_75, %c0_76], %98 {strides = array<i32>} : memref<1x8x128xf32, #tpu.memory_space<vmem>>, vector<1x8x128xf32>,
    return
  }
  func.func @transform_0(%arg0: i32) -> (i32, i32, i32) {
    %c0_i32 = arith.constant 0 : i32
    %c0_i32_0 = arith.constant 0 : i32
    %c0_i32_1 = arith.constant 0 : i32
    return %arg0, %c0_i32, %c0_i32_0 : i32, i32, i32
  }
  func.func @transform_1(%arg0: i32) -> (i32, i32) {
    %c0_i32 = arith.constant 0 : i32
    %c0_i32_0 = arith.constant 0 : i32
    %c0_i32_1 = arith.constant 0 : i32
    return %c0_i32, %c0_i32_0 : i32, i32
  }
  func.func @transform_2(%arg0: i32) -> (i32, i32) {
    %c0_i32 = arith.constant 0 : i32
    %c0_i32_0 = arith.constant 0 : i32
    %c0_i32_1 = arith.constant 0 : i32
    return %c0_i32, %c0_i32_0 : i32, i32
  }
  func.func @transform_3(%arg0: i32) -> (i32, i32) {
    %c0_i32 = arith.constant 0 : i32
    %c0_i32_0 = arith.constant 0 : i32
    %c0_i32_1 = arith.constant 0 : i32
    return %c0_i32, %c0_i32_0 : i32, i32
  }
  func.func @transform_4(%arg0: i32) -> (i32, i32) {
    %c0_i32 = arith.constant 0 : i32
    %c0_i32_0 = arith.constant 0 : i32
    %c0_i32_1 = arith.constant 0 : i32
    return %c0_i32, %c0_i32_0 : i32, i32
  }
  func.func @transform_5(%arg0: i32) -> (i32, i32) {
    %c0_i32 = arith.constant 0 : i32
    %c0_i32_0 = arith.constant 0 : i32
    %c0_i32_1 = arith.constant 0 : i32
    return %c0_i32, %c0_i32_0 : i32, i32
  }
  func.func @transform_6(%arg0: i32) -> (i32, i32, i32) {
    %c0_i32 = arith.constant 0 : i32
    %c0_i32_0 = arith.constant 0 : i32
    %c0_i32_1 = arith.constant 0 : i32
    return %arg0, %c0_i32, %c0_i32_0 : i32, i32, i32
  }
}

</mosaic_0001>

<bundles_post_ra>
// kernel: transformer_layer_fused.1
= control target key start
LH: loop header
LB: loop body
LE: loop exit
PB: predicated region body
PF: predicated region fallthrough
CT: control target
= control target key end

     0   :  { %11 = vsyncpa [#allocation5], 0  ;;  %s3318_s0 = inlined_call_operand.vmem [shape: f32[2,8,128], index: 0, kind: input, shape index: {}]   ;;  %s3319_s1 = inlined_call_operand.hbm [shape: f32[128,1536], index: 1, kind: input, shape index: {}]   ;;  %s3320_s2 = inlined_call_operand.vmem [shape: f32[1,1536], index: 2, kind: input, shape index: {}]   ;;  %s3321_s3 = inlined_call_operand.hbm [shape: f32[512,128], index: 3, kind: input, shape index: {}]   ;;  %s3322_s4 = inlined_call_operand.vmem [shape: f32[1,128], index: 4, kind: input, shape index: {}]   ;;  %s3323_s5 = inlined_call_operand.hbm [shape: f32[128,128], index: 5, kind: input, shape index: {}]   ;;  %s3324_s6 = inlined_call_operand.vmem [shape: f32[2,8,128], index: 6, kind: output, shape index: {}]  }
   0x1   :  { %12 = vsyncpa [#allocation7], 0  ;;  %s3015_s21 = smov 0  }
   0x2 LB: > { %s2970_s22 = smov [#allocation6]   ;;  %s3021_s24 = sadd.s32 4294967295, %s2968_s21   ;;  %s2968_s21 = sphi %s3015_s21, %s18_s21  }
   0x3   : > { %s208_s23 = sshll.u32 %s2970_s22, 4  ;;  %p2154_p0 = scmp.ge.s32.totalorder %s2968_s21, 1  ;;  %s3030_s23 = int_to_ptr.vmem [resolvable:$true] %s208_s23 }
   0x4   : > { %p180_p1 = scmp.lt.s32.totalorder %s2968_s21, 3  ;;  %p3325_p2 = scmp.eq.s32.totalorder %s3021_s24, 0 }
   0x5   : > { %s2971_s26 = smov [#allocation4]   ;;  %s2972_s29 = smov [#allocation8]  }
   0x6   : > { %p3026_p3 = pnand %p2154_p0, %p180_p1  ;;  %s192_s27 = sshll.u32 %s2971_s26, 4  ;;  %s3034_s27 = int_to_ptr.vmem [resolvable:$true] %s192_s27 }
   0x7   : > { %s3042_s30 = sshll.u32 %s2972_s29, 4  ;;  %s2870_s9 = scalar_lea.hbm %s3321_s3, 8192  ;;  %s225_s30 = int_to_ptr.vmem [resolvable:$true] %s3042_s30 }
   0x8   : > { %s3327_s25 = scalar_select %p3026_p3, 1, 0 }
   0x9   : > { %p2819_p4 = pneg %p3026_p3  ;;  %p2871_p6 = scmp.ne.s32.totalorder %s3321_s3, %s2870_s9 }
   0xa   : > { %p2877_p10 = scmp.lt.u32.totalorder %s2870_s9, %s3321_s3 }
   0xb   : > { %p3038_p5 = pnand %p3325_p2, %p2819_p4 }
   0xd   : > { %p3052_p7 = pneg %p3038_p5 }
   0xf   : > { %p2873_p8 = pnand %p3052_p7, %p2871_p6 }
  0x11   : > { %p2874_p9 = pneg %p2873_p8 }
  0x13   : > { %p2879_p11 = pnand %p2877_p10, %p2874_p9 }
  0x15   : > { %2882 = shalt.err (!%p2879_p11)
}
  0x16   : > { %s2883_s15 = scalar_lea.vmem %s3030_s23, 8192  ;;  %p2891_p1 = scmp.lt.s32.totalorder %s3030_s23, %s3030_s23 }
  0x17   : > { %p2884_p12 = scmp.ne.s32.totalorder %s3030_s23, %s2883_s15  ;;  %p2892_p4 = scmp.lt.s32.totalorder %s2883_s15, %s2883_s15 }
  0x19   : > { %p2886_p13 = pnand %p2884_p12, %p3052_p7  ;;  %p2893_p6 = por %p2892_p4, %p2891_p1 }
  0x1b   : > { %p2887_p0 = pneg %p2886_p13 }
  0x1d   : > { %p2894_p8 = pnand %p2893_p6, %p2887_p0 }
  0x1f   : > { %2897 = shalt.err (!%p2894_p8)
}
  0x20   : > { %s2973_s16 = smov 128   ;;  %s2974_s17 = smov 8  }
  0x21   : > { %2825 = dma.hbm_to_vmem [thread:$0]  (!%p3038_p5), %s3321_s3, 8192, %s3030_s23, [#allocation7], %s2973_s16, %s2973_s16, %s2974_s17  }
  0x22   : > { %s2898_s26 = scalar_lea.hbm %s3319_s1, 24576 }
  0x23   : > { %p2899_p9 = scmp.ne.s32.totalorder %s3319_s1, %s2898_s26  ;;  %p2905_p12 = scmp.lt.u32.totalorder %s2898_s26, %s3319_s1 }
  0x25   : > { %p2901_p10 = pnand %p2899_p9, %p3052_p7 }
  0x27   : > { %p2902_p11 = pneg %p2901_p10 }
  0x29   : > { %p2907_p13 = pnand %p2905_p12, %p2902_p11 }
  0x2b   : > { %2910 = shalt.err (!%p2907_p13)
}
  0x2c   : > { %s2911_s23 = scalar_lea.vmem %s3034_s27, 24576  ;;  %p2919_p6 = scmp.lt.s32.totalorder %s3034_s27, %s3034_s27 }
  0x2d   : > { %p2912_p0 = scmp.ne.s32.totalorder %s3034_s27, %s2911_s23  ;;  %p2920_p8 = scmp.lt.s32.totalorder %s2911_s23, %s2911_s23 }
  0x2f   : > { %p2914_p1 = pnand %p2912_p0, %p3052_p7  ;;  %p2921_p9 = por %p2920_p8, %p2919_p6 }
  0x31   : > { %p2915_p4 = pneg %p2914_p1 }
  0x33   : > { %p2922_p10 = pnand %p2921_p9, %p2915_p4 }
  0x35   : > { %2925 = shalt.err (!%p2922_p10)
}
  0x36   : > { %s2975_s10 = smov 1536   ;;  %s2976_s11 = smov 96  }
  0x37   : > { %2822 = dma.hbm_to_vmem [thread:$0]  (!%p3038_p5), %s3319_s1, 24576, %s3034_s27, [#allocation5], %s2975_s10, %s2975_s10, %s2976_s11  }
  0x38   : > { %s2926_s19 = scalar_lea.hbm %s3323_s5, 2048 }
  0x39   : > { %p2927_p11 = scmp.ne.s32.totalorder %s3323_s5, %s2926_s19  ;;  %p2933_p0 = scmp.lt.u32.totalorder %s2926_s19, %s3323_s5 }
  0x3b   : > { %p2929_p12 = pnand %p2927_p11, %p3052_p7 }
  0x3d   : > { %p2930_p13 = pneg %p2929_p12 }
  0x3f   : > { %p2935_p1 = pnand %p2933_p0, %p2930_p13 }
  0x41   : > { %2938 = shalt.err (!%p2935_p1)
}
  0x42   : > { %s2939_s7 = scalar_lea.vmem %s225_s30, 2048  ;;  %p2947_p9 = scmp.lt.s32.totalorder %s225_s30, %s225_s30 }
  0x43   : > { %p2940_p4 = scmp.ne.s32.totalorder %s225_s30, %s2939_s7  ;;  %p2948_p10 = scmp.lt.s32.totalorder %s2939_s7, %s2939_s7 }
  0x45   : > { %p2942_p6 = pnand %p2940_p4, %p3052_p7  ;;  %p2949_p2 = por %p2948_p10, %p2947_p9 }
  0x47   : > { %p2943_p8 = pneg %p2942_p6 }
  0x49   : > { %p2950_p3 = pnand %p2949_p2, %p2943_p8 }
  0x4b   : > { %2953 = shalt.err (!%p2950_p3)
}
  0x4c   : > { %2828 = dma.hbm_to_vmem [thread:$0]  (!%p3038_p5), %s3323_s5, 2048, %s225_s30, [#allocation7], %s2973_s16, %s2973_s16, %s2974_s17  }
  0x4d   : > { %p3330_p11 = scmp.ne.s32.totalorder %s3327_s25, 0 }
  0x4e   : > { %p3331_p7 = scmp.eq.s32.totalorder (!%p3330_p11), %s3021_s24, 0 }
  0x4f   : > { %247 = sbr.rel (%p3330_p11) target bundleno = 2478 (0x9ae), region = 44 }
  0x56   : > { %2959 = dma.done.wait (%p3331_p7), [#allocation5], 24576   ;;  %p3332_p12 = pmov %p3331_p7 }
  0x57   : > { %p3333_p2 = pmov %p3331_p7 }
  0x58   : > { %2961 = vsyncadd (%p3332_p12), [#allocation5], 4294942720 }
  0x59   : > { %2963 = dma.done.wait (%p3333_p2), [#allocation7], 10240   ;;  %p3334_p3 = pmov %p3333_p2 }
  0x5a   : > { %v2977_v0 = vmov 0.0   ;;  %v297_v1 = vld [vmem:[#allocation4 + $0x28] sm:$0xff]  ;;  %v296_v3 = vld [vmem:[#allocation4 + $0x20] sm:$0xff]  ;;  %p283_p5 = scmp.lt.s32.totalorder %s3021_s24, 1  ;;  %vm2978_vm0 = vmmov 0   ;;  %vm1068_vm1 = vcmask 64512  }
  0x5b   : > { %2965 = vsyncadd (%p3334_p3), [#allocation7], 4294957056  ;;  %754 = vmatprep.mubr.f32.mxu0 %v2977_v0  ;;  %612 = vmatprep.mubr.f32.mxu1 %v2977_v0  ;;  %v309_v2 = vld [vmem:[#allocation4 + $0x88] sm:$0xff]  ;;  %v308_v5 = vld [vmem:[#allocation4 + $0x80] sm:$0xff] }
  0x5c   : > { %v2552_v4 = vpack.c.bf16 %v309_v2, %v297_v1  ;;  %v293_v6 = vld [vmem:[#allocation4 + $0x8] sm:$0xff]  ;;  %v2554_v8 = vpack.c.bf16 %v308_v5, %v296_v3  ;;  %v292_v10 = vld [vmem:[#allocation4] sm:$0xff]  ;;  %s3336_s24 = smov (!%p283_p5, %s3021_s24), 1 }
  0x5d   : > { %v305_v7 = vld [vmem:[#allocation4 + $0x68] sm:$0xff]  ;;  %v304_v11 = vld [vmem:[#allocation4 + $0x60] sm:$0xff]  ;;  %s2163_s25 = sshll.u32 %s3336_s24, 3 }
  0x5e   : > { %v2488_v9 = vpack.c.bf16 %v305_v7, %v293_v6  ;;  %v321_v12 = vld [vmem:[#allocation4 + $0xe8] sm:$0xff]  ;;  %2553 = vmatprep.subr.bf16.mxu0 %v2552_v4  ;;  %v2490_v13 = vpack.c.bf16 %v304_v11, %v292_v10  ;;  %v320_v15 = vld [vmem:[#allocation4 + $0xe0] sm:$0xff]  ;;  %s3145_s12 = scalar_lea.vmem %s3318_s0, %s2163_s25  ;;  %s290_s15 = scalar_lea.vmem %s3324_s6, %s2163_s25 }
  0x5f   : > { %v333_v14 = vld [vmem:[#allocation4 + $0x148] sm:$0xff]  ;;  %v332_v16 = vld [vmem:[#allocation4 + $0x140] sm:$0xff]  ;;  %2555 = vmatpush1.bf16.msra.mxu0 %v2554_v8 }
  0x60   : > { %2489 = vmatprep.subr.bf16.mxu1 %v2488_v9  ;;  %v2556_v17 = vpack.c.bf16 %v333_v14, %v321_v12  ;;  %v2558_v18 = vpack.c.bf16 %v332_v16, %v320_v15  ;;  %v317_v19 = vld [vmem:[#allocation4 + $0xc8] sm:$0xff]  ;;  %v316_v21 = vld [vmem:[#allocation4 + $0xc0] sm:$0xff] }
  0x61   : > { %v329_v20 = vld [vmem:[#allocation4 + $0x128] sm:$0xff]  ;;  %2491 = vmatpush1.bf16.msra.mxu1 %v2490_v13  ;;  %v328_v23 = vld [vmem:[#allocation4 + $0x120] sm:$0xff] }
  0x62   : > { %v2492_v22 = vpack.c.bf16 %v329_v20, %v317_v19  ;;  %v345_v24 = vld [vmem:[#allocation4 + $0x1a8] sm:$0xff]  ;;  %2557 = vmatprep.subr.bf16.mxu0 %v2556_v17  ;;  %v2494_v26 = vpack.c.bf16 %v328_v23, %v316_v21  ;;  %v344_v28 = vld [vmem:[#allocation4 + $0x1a0] sm:$0xff] }
  0x63   : > { %v357_v25 = vld [vmem:[#allocation4 + $0x208] sm:$0xff]  ;;  %v356_v29 = vld [vmem:[#allocation4 + $0x200] sm:$0xff]  ;;  %2559 = vmatpush1.bf16.msra.mxu0 %v2558_v18 }
  0x64   : > { %v2560_v27 = vpack.c.bf16 %v357_v25, %v345_v24  ;;  %v341_v30 = vld [vmem:[#allocation4 + $0x188] sm:$0xff]  ;;  %2493 = vmatprep.subr.bf16.mxu1 %v2492_v22  ;;  %v340_v32 = vld [vmem:[#allocation4 + $0x180] sm:$0xff]  ;;  %v2562_v34 = vpack.c.bf16 %v356_v29, %v344_v28 }
  0x65   : > { %v353_v31 = vld [vmem:[#allocation4 + $0x1e8] sm:$0xff]  ;;  %v352_v33 = vld [vmem:[#allocation4 + $0x1e0] sm:$0xff]  ;;  %2495 = vmatpush1.bf16.msra.mxu1 %v2494_v26 }
  0x66   : > { %v2496_v35 = vpack.c.bf16 %v353_v31, %v341_v30  ;;  %v369_v36 = vld [vmem:[#allocation4 + $0x268] sm:$0xff]  ;;  %v368_v38 = vld [vmem:[#allocation4 + $0x260] sm:$0xff]  ;;  %2561 = vmatprep.subr.bf16.mxu0 %v2560_v27  ;;  %v2498_v39 = vpack.c.bf16 %v352_v33, %v340_v32  ;;  %v295_v32 = vld [vmem:[#allocation4 + $0x18] sm:$0xff] }
  0x67   : > { %v381_v37 = vld [vmem:[#allocation4 + $0x2c8] sm:$0xff]  ;;  %v380_v41 = vld [vmem:[#allocation4 + $0x2c0] sm:$0xff]  ;;  %2563 = vmatpush1.bf16.msra.mxu0 %v2562_v34  ;;  %v307_v33 = vld [vmem:[#allocation4 + $0x78] sm:$0xff] }
  0x68   : > { %v2564_v40 = vpack.c.bf16 %v381_v37, %v369_v36  ;;  %v365_v42 = vld [vmem:[#allocation4 + $0x248] sm:$0xff]  ;;  %2497 = vmatprep.subr.bf16.mxu1 %v2496_v35  ;;  %v364_v45 = vld [vmem:[#allocation4 + $0x240] sm:$0xff]  ;;  %v2566_v49 = vpack.c.bf16 %v380_v41, %v368_v38  ;;  %v2520_v36 = vpack.c.bf16 %v307_v33, %v295_v32  ;;  %v294_v37 = vld [vmem:[#allocation4 + $0x10] sm:$0xff] }
  0x69   : > { %v377_v43 = vld [vmem:[#allocation4 + $0x2a8] sm:$0xff]  ;;  %v376_v46 = vld [vmem:[#allocation4 + $0x2a0] sm:$0xff]  ;;  %2499 = vmatpush1.bf16.msra.mxu1 %v2498_v39  ;;  %v306_v38 = vld [vmem:[#allocation4 + $0x70] sm:$0xff] }
  0x6a   : > { %v2500_v44 = vpack.c.bf16 %v377_v43, %v365_v42  ;;  %v393_v47 = vld [vmem:[#allocation4 + $0x328] sm:$0xff]  ;;  %2565 = vmatprep.subr.bf16.mxu0 %v2564_v40  ;;  %v2502_v52 = vpack.c.bf16 %v376_v46, %v364_v45  ;;  %v392_v54 = vld [vmem:[#allocation4 + $0x320] sm:$0xff]  ;;  %v319_v39 = vld [vmem:[#allocation4 + $0xd8] sm:$0xff]  ;;  %v2522_v42 = vpack.c.bf16 %v306_v38, %v294_v37 }
  0x6b   : > { %v405_v48 = vld [vmem:[#allocation4 + $0x388] sm:$0xff]  ;;  %v404_v55 = vld [vmem:[#allocation4 + $0x380] sm:$0xff]  ;;  %2567 = vmatpush1.bf16.msra.mxu0 %v2566_v49  ;;  %v331_v40 = vld [vmem:[#allocation4 + $0x138] sm:$0xff] }
  0x6c   : > { %v389_v50 = vld [vmem:[#allocation4 + $0x308] sm:$0xff]  ;;  %v2568_v53 = vpack.c.bf16 %v405_v48, %v393_v47  ;;  %v388_v56 = vld [vmem:[#allocation4 + $0x300] sm:$0xff]  ;;  %2501 = vmatprep.subr.bf16.mxu1 %v2500_v44  ;;  %v2570_v63 = vpack.c.bf16 %v404_v55, %v392_v54  ;;  %v2524_v43 = vpack.c.bf16 %v331_v40, %v319_v39  ;;  %v318_v44 = vld [vmem:[#allocation4 + $0xd0] sm:$0xff] }
  0x6d   : > { %v401_v51 = vld [vmem:[#allocation4 + $0x368] sm:$0xff]  ;;  %v400_v58 = vld [vmem:[#allocation4 + $0x360] sm:$0xff]  ;;  %2503 = vmatpush1.bf16.msra.mxu1 %v2502_v52  ;;  %v330_v45 = vld [vmem:[#allocation4 + $0x130] sm:$0xff] }
  0x6e   : > { %v2504_v57 = vpack.c.bf16 %v401_v51, %v389_v50  ;;  %v417_v59 = vld [vmem:[#allocation4 + $0x3e8] sm:$0xff]  ;;  %2569 = vmatprep.subr.bf16.mxu0 %v2568_v53  ;;  %v2506_v1 = vpack.c.bf16 %v400_v58, %v388_v56  ;;  %v416_v3 = vld [vmem:[#allocation4 + $0x3e0] sm:$0xff]  ;;  %v343_v46 = vld [vmem:[#allocation4 + $0x198] sm:$0xff]  ;;  %v2526_v48 = vpack.c.bf16 %v330_v45, %v318_v44 }
  0x6f   : > { %v429_v60 = vld [vmem:[#allocation4 + $0x448] sm:$0xff]  ;;  %v428_v4 = vld [vmem:[#allocation4 + $0x440] sm:$0xff]  ;;  %2571 = vmatpush1.bf16.msra.mxu0 %v2570_v63  ;;  %v355_v47 = vld [vmem:[#allocation4 + $0x1f8] sm:$0xff] }
  0x70   : > { %v413_v61 = vld [vmem:[#allocation4 + $0x3c8] sm:$0xff]  ;;  %v2572_v2 = vpack.c.bf16 %v429_v60, %v417_v59  ;;  %v412_v5 = vld [vmem:[#allocation4 + $0x3c0] sm:$0xff]  ;;  %2505 = vmatprep.subr.bf16.mxu1 %v2504_v57  ;;  %v2574_v12 = vpack.c.bf16 %v428_v4, %v416_v3  ;;  %v2528_v49 = vpack.c.bf16 %v355_v47, %v343_v46  ;;  %v342_v50 = vld [vmem:[#allocation4 + $0x190] sm:$0xff] }
  0x71   : > { %v425_v62 = vld [vmem:[#allocation4 + $0x428] sm:$0xff]  ;;  %v424_v7 = vld [vmem:[#allocation4 + $0x420] sm:$0xff]  ;;  %2507 = vmatpush1.bf16.msra.mxu1 %v2506_v1  ;;  %v354_v51 = vld [vmem:[#allocation4 + $0x1f0] sm:$0xff] }
  0x72   : > { %v2508_v6 = vpack.c.bf16 %v425_v62, %v413_v61  ;;  %v441_v8 = vld [vmem:[#allocation4 + $0x4a8] sm:$0xff]  ;;  %2573 = vmatprep.subr.bf16.mxu0 %v2572_v2  ;;  %v2510_v13 = vpack.c.bf16 %v424_v7, %v412_v5  ;;  %v440_v15 = vld [vmem:[#allocation4 + $0x4a0] sm:$0xff]  ;;  %v367_v52 = vld [vmem:[#allocation4 + $0x258] sm:$0xff]  ;;  %v2530_v54 = vpack.c.bf16 %v354_v51, %v342_v50 }
  0x73   : > { %v453_v9 = vld [vmem:[#allocation4 + $0x508] sm:$0xff]  ;;  %v452_v16 = vld [vmem:[#allocation4 + $0x500] sm:$0xff]  ;;  %2575 = vmatpush1.bf16.msra.mxu0 %v2574_v12  ;;  %v379_v53 = vld [vmem:[#allocation4 + $0x2b8] sm:$0xff] }
  0x74   : > { %v437_v10 = vld [vmem:[#allocation4 + $0x488] sm:$0xff]  ;;  %v2576_v14 = vpack.c.bf16 %v453_v9, %v441_v8  ;;  %v436_v17 = vld [vmem:[#allocation4 + $0x480] sm:$0xff]  ;;  %2509 = vmatprep.subr.bf16.mxu1 %v2508_v6  ;;  %v2578_v24 = vpack.c.bf16 %v452_v16, %v440_v15  ;;  %v2532_v55 = vpack.c.bf16 %v379_v53, %v367_v52  ;;  %v366_v56 = vld [vmem:[#allocation4 + $0x250] sm:$0xff] }
  0x75   : > { %v449_v11 = vld [vmem:[#allocation4 + $0x4e8] sm:$0xff]  ;;  %v448_v19 = vld [vmem:[#allocation4 + $0x4e0] sm:$0xff]  ;;  %2511 = vmatpush1.bf16.msra.mxu1 %v2510_v13  ;;  %v378_v57 = vld [vmem:[#allocation4 + $0x2b0] sm:$0xff] }
  0x76   : > { %v2512_v18 = vpack.c.bf16 %v449_v11, %v437_v10  ;;  %v465_v20 = vld [vmem:[#allocation4 + $0x568] sm:$0xff]  ;;  %2577 = vmatprep.subr.bf16.mxu0 %v2576_v14  ;;  %v2514_v25 = vpack.c.bf16 %v448_v19, %v436_v17  ;;  %v464_v27 = vld [vmem:[#allocation4 + $0x560] sm:$0xff]  ;;  %v391_v58 = vld [vmem:[#allocation4 + $0x318] sm:$0xff]  ;;  %v2534_v60 = vpack.c.bf16 %v378_v57, %v366_v56 }
  0x77   : > { %v477_v21 = vld [vmem:[#allocation4 + $0x5c8] sm:$0xff]  ;;  %v476_v28 = vld [vmem:[#allocation4 + $0x5c0] sm:$0xff]  ;;  %2579 = vmatpush1.bf16.msra.mxu0 %v2578_v24  ;;  %v403_v59 = vld [vmem:[#allocation4 + $0x378] sm:$0xff] }
  0x78   : > { %v461_v22 = vld [vmem:[#allocation4 + $0x548] sm:$0xff]  ;;  %v2580_v26 = vpack.c.bf16 %v477_v21, %v465_v20  ;;  %2513 = vmatprep.subr.bf16.mxu1 %v2512_v18  ;;  %v460_v30 = vld [vmem:[#allocation4 + $0x540] sm:$0xff]  ;;  %v2582_v34 = vpack.c.bf16 %v476_v28, %v464_v27  ;;  %v2536_v61 = vpack.c.bf16 %v403_v59, %v391_v58  ;;  %v390_v62 = vld [vmem:[#allocation4 + $0x310] sm:$0xff] }
  0x79   : > { %v473_v23 = vld [vmem:[#allocation4 + $0x5a8] sm:$0xff]  ;;  %v472_v31 = vld [vmem:[#allocation4 + $0x5a0] sm:$0xff]  ;;  %2515 = vmatpush1.bf16.msra.mxu1 %v2514_v25  ;;  %v402_v63 = vld [vmem:[#allocation4 + $0x370] sm:$0xff] }
  0x7a   : > { %v2516_v29 = vpack.c.bf16 %v473_v23, %v461_v22  ;;  %2581 = vmatprep.subr.bf16.mxu0 %v2580_v26  ;;  %v2518_v35 = vpack.c.bf16 %v472_v31, %v460_v30  ;;  %v3148_v41 = vld [vmem:[%s3145_s12] sm:$0xff]  ;;  %v415_v1 = vld [vmem:[#allocation4 + $0x3d8] sm:$0xff]  ;;  %v2538_v3 = vpack.c.bf16 %v402_v63, %v390_v62  ;;  %v414_v5 = vld [vmem:[#allocation4 + $0x3d0] sm:$0xff] }
  0x7b   : > { %2583 = vmatpush1.bf16.msra.mxu0 %v2582_v34  ;;  %v427_v2 = vld [vmem:[#allocation4 + $0x438] sm:$0xff]  ;;  %v426_v6 = vld [vmem:[#allocation4 + $0x430] sm:$0xff] }
  0x7c   : > { %2517 = vmatprep.subr.bf16.mxu1 %v2516_v29  ;;  %v2540_v4 = vpack.c.bf16 %v427_v2, %v415_v1  ;;  %v439_v7 = vld [vmem:[#allocation4 + $0x498] sm:$0xff]  ;;  %v2542_v9 = vpack.c.bf16 %v426_v6, %v414_v5  ;;  %v438_v11 = vld [vmem:[#allocation4 + $0x490] sm:$0xff] }
  0x7d   : > { %2519 = vmatpush1.bf16.msra.mxu1 %v2518_v35  ;;  %v451_v8 = vld [vmem:[#allocation4 + $0x4f8] sm:$0xff]  ;;  %v450_v12 = vld [vmem:[#allocation4 + $0x4f0] sm:$0xff] }
  0x7e   : > { %2521 = vmatprep.subr.bf16.mxu1 %v2520_v36  ;;  %755 = vmatmul.mubr.f32.vlgmr.msra.gmra.mrb[0].mxu0 %v3148_v41  ;;  %v2544_v10 = vpack.c.bf16 %v451_v8, %v439_v7  ;;  %v463_v13 = vld [vmem:[#allocation4 + $0x558] sm:$0xff]  ;;  %v2546_v15 = vpack.c.bf16 %v450_v12, %v438_v11  ;;  %v462_v17 = vld [vmem:[#allocation4 + $0x550] sm:$0xff] }
  0x7f   : > { %896 = vmatprep.mubr.f32.mxu0 %v2977_v0  ;;  %v475_v14 = vld [vmem:[#allocation4 + $0x5b8] sm:$0xff]  ;;  %v474_v18 = vld [vmem:[#allocation4 + $0x5b0] sm:$0xff] }
  0x80   : > { %613 = vmatmul.mubr.f32.vlgmr.msra.gmra.mrb[0].mxu1 %v3148_v41  ;;  %v2548_v16 = vpack.c.bf16 %v475_v14, %v463_v13  ;;  %v299_v19 = vld [vmem:[#allocation4 + $0x38] sm:$0xff]  ;;  %v2550_v21 = vpack.c.bf16 %v474_v18, %v462_v17  ;;  %v298_v23 = vld [vmem:[#allocation4 + $0x30] sm:$0xff] }
  0x81   : > { %2523 = vmatpush1.bf16.msra.mxu1 %v2522_v42  ;;  %683 = vmatprep.mubr.f32.mxu1 %v2977_v0  ;;  %v311_v20 = vld [vmem:[#allocation4 + $0x98] sm:$0xff]  ;;  %v310_v24 = vld [vmem:[#allocation4 + $0x90] sm:$0xff] }
  0x82   : > { %2525 = vmatprep.subr.bf16.mxu1 %v2524_v43  ;;  %v2584_v22 = vpack.c.bf16 %v311_v20, %v299_v19  ;;  %v323_v25 = vld [vmem:[#allocation4 + $0xf8] sm:$0xff]  ;;  %v2586_v27 = vpack.c.bf16 %v310_v24, %v298_v23  ;;  %v322_v29 = vld [vmem:[#allocation4 + $0xf0] sm:$0xff] }
  0x83   : > { %v335_v26 = vld [vmem:[#allocation4 + $0x158] sm:$0xff]  ;;  %v334_v30 = vld [vmem:[#allocation4 + $0x150] sm:$0xff] }
  0x84   : > { %v2588_v28 = vpack.c.bf16 %v335_v26, %v323_v25  ;;  %v347_v31 = vld [vmem:[#allocation4 + $0x1b8] sm:$0xff]  ;;  %v2590_v33 = vpack.c.bf16 %v334_v30, %v322_v29  ;;  %v346_v35 = vld [vmem:[#allocation4 + $0x1b0] sm:$0xff] }
  0x85   : > { %2527 = vmatpush1.bf16.msra.mxu1 %v2526_v48  ;;  %v359_v32 = vld [vmem:[#allocation4 + $0x218] sm:$0xff]  ;;  %v358_v36 = vld [vmem:[#allocation4 + $0x210] sm:$0xff] }
  0x86   : > { %2529 = vmatprep.subr.bf16.mxu1 %v2528_v49  ;;  %v2592_v34 = vpack.c.bf16 %v359_v32, %v347_v31  ;;  %v371_v37 = vld [vmem:[#allocation4 + $0x278] sm:$0xff]  ;;  %v2594_v39 = vpack.c.bf16 %v358_v36, %v346_v35  ;;  %v370_v42 = vld [vmem:[#allocation4 + $0x270] sm:$0xff] }
  0x87   : > { %v383_v38 = vld [vmem:[#allocation4 + $0x2d8] sm:$0xff]  ;;  %v382_v43 = vld [vmem:[#allocation4 + $0x2d0] sm:$0xff] }
  0x88   : > { %v2596_v40 = vpack.c.bf16 %v383_v38, %v371_v37  ;;  %v395_v44 = vld [vmem:[#allocation4 + $0x338] sm:$0xff]  ;;  %v2598_v46 = vpack.c.bf16 %v382_v43, %v370_v42  ;;  %v394_v48 = vld [vmem:[#allocation4 + $0x330] sm:$0xff] }
  0x89   : > { %2531 = vmatpush1.bf16.msra.mxu1 %v2530_v54  ;;  %v407_v45 = vld [vmem:[#allocation4 + $0x398] sm:$0xff]  ;;  %v406_v49 = vld [vmem:[#allocation4 + $0x390] sm:$0xff] }
  0x8a   : > { %2533 = vmatprep.subr.bf16.mxu1 %v2532_v55  ;;  %v2600_v47 = vpack.c.bf16 %v407_v45, %v395_v44  ;;  %v419_v50 = vld [vmem:[#allocation4 + $0x3f8] sm:$0xff]  ;;  %v2602_v52 = vpack.c.bf16 %v406_v49, %v394_v48  ;;  %v418_v54 = vld [vmem:[#allocation4 + $0x3f0] sm:$0xff] }
  0x8b   : > { %v431_v51 = vld [vmem:[#allocation4 + $0x458] sm:$0xff]  ;;  %v430_v55 = vld [vmem:[#allocation4 + $0x450] sm:$0xff] }
  0x8c   : > { %v2604_v53 = vpack.c.bf16 %v431_v51, %v419_v50  ;;  %v443_v56 = vld [vmem:[#allocation4 + $0x4b8] sm:$0xff]  ;;  %v2606_v58 = vpack.c.bf16 %v430_v55, %v418_v54  ;;  %v301_v54 = vld [vmem:[#allocation4 + $0x48] sm:$0xff] }
  0x8d   : > { %2535 = vmatpush1.bf16.msra.mxu1 %v2534_v60  ;;  %v455_v57 = vld [vmem:[#allocation4 + $0x518] sm:$0xff]  ;;  %v442_v60 = vld [vmem:[#allocation4 + $0x4b0] sm:$0xff]  ;;  %v313_v55 = vld [vmem:[#allocation4 + $0xa8] sm:$0xff] }
  0x8e   : > { %2537 = vmatprep.subr.bf16.mxu1 %v2536_v61  ;;  %v2608_v59 = vpack.c.bf16 %v455_v57, %v443_v56  ;;  %v454_v61 = vld [vmem:[#allocation4 + $0x510] sm:$0xff]  ;;  %v467_v62 = vld [vmem:[#allocation4 + $0x578] sm:$0xff]  ;;  %v300_v56 = vld [vmem:[#allocation4 + $0x40] sm:$0xff] }
  0x8f   : > { %v479_v63 = vld [vmem:[#allocation4 + $0x5d8] sm:$0xff]  ;;  %v2610_v1 = vpack.c.bf16 %v454_v61, %v442_v60  ;;  %v325_v60 = vld [vmem:[#allocation4 + $0x108] sm:$0xff] }
  0x90   : > { %v2612_v2 = vpack.c.bf16 %v479_v63, %v467_v62  ;;  %v303_v5 = vld [vmem:[#allocation4 + $0x58] sm:$0xff]  ;;  %v337_v61 = vld [vmem:[#allocation4 + $0x168] sm:$0xff] }
  0x91   : > { %2539 = vmatpush1.bf16.msra.mxu1 %v2538_v3  ;;  %v466_v3 = vld [vmem:[#allocation4 + $0x570] sm:$0xff]  ;;  %v315_v6 = vld [vmem:[#allocation4 + $0xb8] sm:$0xff]  ;;  %v2620_v63 = vpack.c.bf16 %v337_v61, %v325_v60 }
  0x92   : > { %2541 = vmatprep.subr.bf16.mxu1 %v2540_v4  ;;  %v478_v4 = vld [vmem:[#allocation4 + $0x5d0] sm:$0xff]  ;;  %v2648_v8 = vpack.c.bf16 %v315_v6, %v303_v5  ;;  %v327_v11 = vld [vmem:[#allocation4 + $0x118] sm:$0xff] }
  0x93   : > { %v2614_v7 = vpack.c.bf16 %v478_v4, %v466_v3  ;;  %v339_v12 = vld [vmem:[#allocation4 + $0x178] sm:$0xff]  ;;  %v349_v3 = vld [vmem:[#allocation4 + $0x1c8] sm:$0xff] }
  0x94   : > { %v2652_v14 = vpack.c.bf16 %v339_v12, %v327_v11  ;;  %v351_v17 = vld [vmem:[#allocation4 + $0x1d8] sm:$0xff]  ;;  %v361_v4 = vld [vmem:[#allocation4 + $0x228] sm:$0xff] }
  0x95   : > { %2543 = vmatpush1.bf16.msra.mxu1 %v2542_v9  ;;  %v302_v9 = vld [vmem:[#allocation4 + $0x50] sm:$0xff]  ;;  %v363_v18 = vld [vmem:[#allocation4 + $0x238] sm:$0xff]  ;;  %v2624_v6 = vpack.c.bf16 %v361_v4, %v349_v3 }
  0x96   : > { %2545 = vmatprep.subr.bf16.mxu1 %v2544_v10  ;;  %v314_v10 = vld [vmem:[#allocation4 + $0xb0] sm:$0xff]  ;;  %v2656_v20 = vpack.c.bf16 %v363_v18, %v351_v17  ;;  %v375_v23 = vld [vmem:[#allocation4 + $0x298] sm:$0xff] }
  0x97   : > { %v2650_v13 = vpack.c.bf16 %v314_v10, %v302_v9  ;;  %v387_v24 = vld [vmem:[#allocation4 + $0x2f8] sm:$0xff]  ;;  %v373_v9 = vld [vmem:[#allocation4 + $0x288] sm:$0xff] }
  0x98   : > { %v2660_v26 = vpack.c.bf16 %v387_v24, %v375_v23  ;;  %v399_v29 = vld [vmem:[#allocation4 + $0x358] sm:$0xff]  ;;  %v385_v10 = vld [vmem:[#allocation4 + $0x2e8] sm:$0xff] }
  0x99   : > { %2547 = vmatpush1.bf16.msra.mxu1 %v2546_v15  ;;  %v326_v15 = vld [vmem:[#allocation4 + $0x110] sm:$0xff]  ;;  %v411_v30 = vld [vmem:[#allocation4 + $0x3b8] sm:$0xff]  ;;  %v2628_v12 = vpack.c.bf16 %v385_v10, %v373_v9 }
  0x9a   : > { %2549 = vmatprep.subr.bf16.mxu1 %v2548_v16  ;;  %v338_v16 = vld [vmem:[#allocation4 + $0x170] sm:$0xff]  ;;  %v2664_v32 = vpack.c.bf16 %v411_v30, %v399_v29  ;;  %v423_v35 = vld [vmem:[#allocation4 + $0x418] sm:$0xff]  ;;  %v457_v29 = vld [vmem:[#allocation4 + $0x528] sm:$0xff] }
  0x9b   : > { %v2654_v19 = vpack.c.bf16 %v338_v16, %v326_v15  ;;  %v435_v36 = vld [vmem:[#allocation4 + $0x478] sm:$0xff]  ;;  %v397_v15 = vld [vmem:[#allocation4 + $0x348] sm:$0xff]  ;;  %v444_v30 = vld [vmem:[#allocation4 + $0x4c0] sm:$0xff] }
  0x9c   : > { %v2668_v38 = vpack.c.bf16 %v435_v36, %v423_v35  ;;  %v447_v42 = vld [vmem:[#allocation4 + $0x4d8] sm:$0xff]  ;;  %v409_v16 = vld [vmem:[#allocation4 + $0x3a8] sm:$0xff] }
  0x9d   : > { %2551 = vmatpush1.bf16.msra.mxu1 %v2550_v21  ;;  %v350_v21 = vld [vmem:[#allocation4 + $0x1d0] sm:$0xff]  ;;  %v459_v43 = vld [vmem:[#allocation4 + $0x538] sm:$0xff]  ;;  %v2632_v18 = vpack.c.bf16 %v409_v16, %v397_v15  ;;  %v1154_v16 = vld [vmem:[#allocation6] sm:$0xff] }
  0x9e   : > { %2585 = vmatprep.subr.bf16.mxu1 %v2584_v22  ;;  %v362_v22 = vld [vmem:[#allocation4 + $0x230] sm:$0xff]  ;;  %v2672_v45 = vpack.c.bf16 %v459_v43, %v447_v42  ;;  %v471_v48 = vld [vmem:[#allocation4 + $0x598] sm:$0xff] }
  0x9f   : > { %v2658_v25 = vpack.c.bf16 %v362_v22, %v350_v21  ;;  %v483_v49 = vld [vmem:[#allocation4 + $0x5f8] sm:$0xff]  ;;  %v421_v21 = vld [vmem:[#allocation4 + $0x408] sm:$0xff] }
  0xa0   : > { %684 = vmatmul.mubr.f32.vlgmr.msra.gmra.mrb[2].mxu1 %v3148_v41  ;;  %v2676_v51 = vpack.c.bf16 %v483_v49, %v471_v48  ;;  %v433_v22 = vld [vmem:[#allocation4 + $0x468] sm:$0xff] }
  0xa1   : > { %2587 = vmatpush1.bf16.msra.mxu1 %v2586_v27  ;;  %825 = vmatprep.mubr.f32.mxu1 %v2977_v0  ;;  %v374_v27 = vld [vmem:[#allocation4 + $0x290] sm:$0xff]  ;;  %v2636_v24 = vpack.c.bf16 %v433_v22, %v421_v21  ;;  %v1157_v21 = vld [vmem:[#allocation6 + $0x18] sm:$0xff] }
  0xa2   : > { %2589 = vmatprep.subr.bf16.mxu1 %v2588_v28  ;;  %v386_v28 = vld [vmem:[#allocation4 + $0x2f0] sm:$0xff] }
  0xa3   : > { %v2662_v31 = vpack.c.bf16 %v386_v28, %v374_v27  ;;  %v445_v28 = vld [vmem:[#allocation4 + $0x4c8] sm:$0xff] }
  0xa5   : > { %2591 = vmatpush1.bf16.msra.mxu1 %v2590_v33  ;;  %v398_v33 = vld [vmem:[#allocation4 + $0x350] sm:$0xff] }
  0xa6   : > { %2593 = vmatprep.subr.bf16.mxu1 %v2592_v34  ;;  %v410_v34 = vld [vmem:[#allocation4 + $0x3b0] sm:$0xff] }
  0xa7   : > { %v2666_v37 = vpack.c.bf16 %v410_v34, %v398_v33  ;;  %v469_v33 = vld [vmem:[#allocation4 + $0x588] sm:$0xff] }
  0xa8   : > { %v481_v34 = vld [vmem:[#allocation4 + $0x5e8] sm:$0xff] }
  0xa9   : > { %2595 = vmatpush1.bf16.msra.mxu1 %v2594_v39  ;;  %v422_v39 = vld [vmem:[#allocation4 + $0x410] sm:$0xff]  ;;  %v2644_v36 = vpack.c.bf16 %v481_v34, %v469_v33 }
  0xaa   : > { %2597 = vmatprep.subr.bf16.mxu1 %v2596_v40  ;;  %v434_v40 = vld [vmem:[#allocation4 + $0x470] sm:$0xff] }
  0xab   : > { %v2670_v44 = vpack.c.bf16 %v434_v40, %v422_v39  ;;  %v488_v40 = vlaneseq }
  0xad   : > { %2599 = vmatpush1.bf16.msra.mxu1 %v2598_v46  ;;  %v446_v46 = vld [vmem:[#allocation4 + $0x4d0] sm:$0xff]  ;;  %v3165_v42 = vshrl.u32 %v488_v40, 7 }
  0xae   : > { %2601 = vmatprep.subr.bf16.mxu1 %v2600_v47  ;;  %v458_v47 = vld [vmem:[#allocation4 + $0x530] sm:$0xff] }
  0xaf   : > { %v2674_v50 = vpack.c.bf16 %v458_v47, %v446_v46  ;;  %v506_v43 = vsub.s32 4, %v3165_v42 }
  0xb1   : > { %2603 = vmatpush1.bf16.msra.mxu1 %v2602_v52  ;;  %v470_v52 = vld [vmem:[#allocation4 + $0x590] sm:$0xff] }
  0xb2   : > { %2605 = vmatprep.subr.bf16.mxu1 %v2604_v53  ;;  %v482_v53 = vld [vmem:[#allocation4 + $0x5f0] sm:$0xff] }
  0xb3   : > { %v2678_v57 = vpack.c.bf16 %v482_v53, %v470_v52 }
  0xb5   : > { %2607 = vmatpush1.bf16.msra.mxu1 %v2606_v58  ;;  %v2616_v58 = vpack.c.bf16 %v313_v55, %v301_v54 }
  0xb6   : > { %2609 = vmatprep.subr.bf16.mxu1 %v2608_v59  ;;  %v312_v59 = vld [vmem:[#allocation4 + $0xa0] sm:$0xff] }
  0xb7   : > { %v2618_v62 = vpack.c.bf16 %v312_v59, %v300_v56  ;;  %2617 = vmatprep.subr.bf16.mxu0 %v2616_v58 }
  0xb9   : > { %2611 = vmatpush1.bf16.msra.mxu1 %v2610_v1  ;;  %v324_v1 = vld [vmem:[#allocation4 + $0x100] sm:$0xff]  ;;  %2619 = vmatpush1.bf16.msra.mxu0 %v2618_v62  ;;  %v3195_v62 = vld [vmem:[%s3320_s2 + $0x8] sm:$0xf] }
  0xba   : > { %2613 = vmatprep.subr.bf16.mxu1 %v2612_v2  ;;  %v336_v2 = vld [vmem:[#allocation4 + $0x160] sm:$0xff]  ;;  %2621 = vmatprep.subr.bf16.mxu0 %v2620_v63 }
  0xbb   : > { %v2622_v5 = vpack.c.bf16 %v336_v2, %v324_v1 }
  0xbd   : > { %2615 = vmatpush1.bf16.msra.mxu1 %v2614_v7  ;;  %v348_v7 = vld [vmem:[#allocation4 + $0x1c0] sm:$0xff]  ;;  %2623 = vmatpush1.bf16.msra.mxu0 %v2622_v5 }
  0xbe   : > { %2649 = vmatprep.subr.bf16.mxu1 %v2648_v8  ;;  %v360_v8 = vld [vmem:[#allocation4 + $0x220] sm:$0xff]  ;;  %2625 = vmatprep.subr.bf16.mxu0 %v2624_v6 }
  0xbf   : > { %v2626_v11 = vpack.c.bf16 %v360_v8, %v348_v7  ;;  %v510_v7 = vsub.s32 5, %v3165_v42  ;;  %v494_v8 = vsub.s32 1, %v3165_v42 }
  0xc0   : > { %826 = vmatmul.mubr.f32.vlgmr.msra.gmra.mrb[4].mxu1 %v3148_v41 }
  0xc1   : > { %2651 = vmatpush1.bf16.msra.mxu1 %v2650_v13  ;;  %967 = vmatprep.mubr.f32.mxu1 %v2977_v0  ;;  %v372_v13 = vld [vmem:[#allocation4 + $0x280] sm:$0xff] }
  0xc2   : > { %2653 = vmatprep.subr.bf16.mxu1 %v2652_v14  ;;  %v384_v14 = vld [vmem:[#allocation4 + $0x2e0] sm:$0xff]  ;;  %2627 = vmatpush1.bf16.msra.mxu0 %v2626_v11 }
  0xc3   : > { %v2630_v17 = vpack.c.bf16 %v384_v14, %v372_v13  ;;  %2629 = vmatprep.subr.bf16.mxu0 %v2628_v12  ;;  %v527_v13 = vrot.slane %v3195_v62, %v494_v8 }
  0xc5   : > { %2655 = vmatpush1.bf16.msra.mxu1 %v2654_v19  ;;  %v396_v19 = vld [vmem:[#allocation4 + $0x340] sm:$0xff] }
  0xc6   : > { %2657 = vmatprep.subr.bf16.mxu1 %v2656_v20  ;;  %v408_v20 = vld [vmem:[#allocation4 + $0x3a0] sm:$0xff]  ;;  %2631 = vmatpush1.bf16.msra.mxu0 %v2630_v17  ;;  %v1155_v17 = vld [vmem:[#allocation6 + $0x8] sm:$0xff] }
  0xc7   : > { %v2634_v23 = vpack.c.bf16 %v408_v20, %v396_v19  ;;  %2633 = vmatprep.subr.bf16.mxu0 %v2632_v18  ;;  %v1156_v18 = vld [vmem:[#allocation6 + $0x10] sm:$0xff]  ;;  %v2979_v19 = vmov 0.0|0.0   ;;  %v2681_v20 = vpack.c.bf16 %v1155_v17, %v1154_v16 }
  0xc8   : > { %v2684_v22 = vpack.c.bf16 %v1157_v21, %v1156_v18 }
  0xc9   : > { %2659 = vmatpush1.bf16.msra.mxu1 %v2658_v25  ;;  %v420_v25 = vld [vmem:[#allocation4 + $0x400] sm:$0xff] }
  0xca   : > { %2661 = vmatprep.subr.bf16.mxu1 %v2660_v26  ;;  %2635 = vmatpush1.bf16.msra.mxu0 %v2634_v23  ;;  %v432_v26 = vld [vmem:[#allocation4 + $0x460] sm:$0xff] }
  0xcb   : > { %2637 = vmatprep.subr.bf16.mxu0 %v2636_v24  ;;  %v2638_v27 = vpack.c.bf16 %v432_v26, %v420_v25  ;;  %v1158_v23 = vld [vmem:[#allocation6 + $0x20] sm:$0xff]  ;;  %v1159_v24 = vld [vmem:[#allocation6 + $0x28] sm:$0xff]  ;;  %v1160_v26 = vld [vmem:[#allocation6 + $0x30] sm:$0xff] }
  0xcc   : > { %v2687_v25 = vpack.c.bf16 %v1159_v24, %v1158_v23  ;;  %v1403_v24 = vld [vmem:[#allocation6 + $0x98] sm:$0xff] }
  0xcd   : > { %2663 = vmatpush1.bf16.msra.mxu1 %v2662_v31  ;;  %v2640_v31 = vpack.c.bf16 %v457_v29, %v445_v28 }
  0xce   : > { %2665 = vmatprep.subr.bf16.mxu1 %v2664_v32  ;;  %v456_v32 = vld [vmem:[#allocation4 + $0x520] sm:$0xff]  ;;  %2639 = vmatpush1.bf16.msra.mxu0 %v2638_v27  ;;  %v1161_v27 = vld [vmem:[#allocation6 + $0x38] sm:$0xff] }
  0xcf   : > { %v2642_v35 = vpack.c.bf16 %v456_v32, %v444_v30  ;;  %2641 = vmatprep.subr.bf16.mxu0 %v2640_v31  ;;  %v2690_v28 = vpack.c.bf16 %v1161_v27, %v1160_v26  ;;  %v1405_v26 = vld [vmem:[#allocation6 + $0xa8] sm:$0xff]  ;;  %v1406_v27 = vld [vmem:[#allocation6 + $0xb0] sm:$0xff] }
  0xd1   : > { %2667 = vmatpush1.bf16.msra.mxu1 %v2666_v37  ;;  %v468_v37 = vld [vmem:[#allocation4 + $0x580] sm:$0xff] }
  0xd2   : > { %2669 = vmatprep.subr.bf16.mxu1 %v2668_v38  ;;  %v480_v38 = vld [vmem:[#allocation4 + $0x5e0] sm:$0xff]  ;;  %2643 = vmatpush1.bf16.msra.mxu0 %v2642_v35 }
  0xd3   : > { %v2646_v39 = vpack.c.bf16 %v480_v38, %v468_v37  ;;  %2645 = vmatprep.subr.bf16.mxu0 %v2644_v36  ;;  %v1162_v35 = vld [vmem:[#allocation6 + $0x40] sm:$0xff]  ;;  %v1163_v36 = vld [vmem:[#allocation6 + $0x48] sm:$0xff]  ;;  %v1164_v38 = vld [vmem:[#allocation6 + $0x50] sm:$0xff] }
  0xd4   : > { %v2693_v37 = vpack.c.bf16 %v1163_v36, %v1162_v35  ;;  %v1408_v36 = vld [vmem:[#allocation6 + $0xc0] sm:$0xff] }
  0xd5   : > { %2671 = vmatpush1.bf16.msra.mxu1 %v2670_v44  ;;  %v3171_v44 = vld [vmem:[%s3320_s2] sm:$0xff] }
  0xd6   : > { %2673 = vmatprep.subr.bf16.mxu1 %v2672_v45  ;;  %2647 = vmatpush1.bf16.msra.mxu0 %v2646_v39  ;;  %v490_v45 = vsub.s32 0, %v3165_v42  ;;  %v507_v46 = vrot.slane %v3171_v44, %v506_v43  ;;  %v511_v9 = vrot.slane %v3171_v44, %v510_v7  ;;  %v495_v10 = vrot.slane %v3171_v44, %v494_v8  ;;  %v1165_v39 = vld [vmem:[#allocation6 + $0x58] sm:$0xff]  ;;  %v1166_v43 = vld [vmem:[#allocation6 + $0x60] sm:$0xff] }
  0xd7   : > { %2680 = vmatprep.subr.bf16.mxu0 %v2979_v19  ;;  %v2696_v40 = vpack.c.bf16 %v1165_v39, %v1164_v38  ;;  %v1410_v39 = vld [vmem:[#allocation6 + $0xd0] sm:$0xff] }
  0xd8   : > { %v491_v47 = vrot.slane %v3171_v44, %v490_v45  ;;  %v523_v63 = vrot.slane %v3195_v62, %v490_v45  ;;  %v1167_v45 = vld [vmem:[#allocation6 + $0x68] sm:$0xff] }
  0xd9   : > { %2675 = vmatpush1.bf16.msra.mxu1 %v2674_v50  ;;  %897 = vmatmul.mubr.f32.vlgmr.msra.gmra.mrb[2].mxu0 %v3148_v41 }
  0xda   : > { %2677 = vmatprep.subr.bf16.mxu1 %v2676_v51  ;;  %2315 = vmatprep.mubr.msk.f32.mxu0 %vm2978_vm0, %v2977_v0 }
  0xdb   : > { %2682 = vmatpush3.bf16.msra.mxu0 %v2681_v20 }
  0xdc   : > { %2683 = vmatprep.subr.bf16.mxu0 %v2979_v19 }
  0xdd   : > { %2679 = vmatpush1.bf16.msra.mxu1 %v2678_v57 }
  0xde   : > { %2273 = vmatprep.subr.mxu1 %v2977_v0 }
  0xdf   : > { %2685 = vmatpush3.bf16.msra.mxu0 %v2684_v22 }
  0xe0   : > { %968 = vmatmul.mubr.f32.vlgmr.msra.gmra.mrb[6].mxu1 %v3148_v41  ;;  %2686 = vmatprep.subr.bf16.mxu0 %v2979_v19 }
  0xe1   : > { %2275 = vmatprep.mubr.msk.f32.mxu1 %vm2978_vm0, %v2977_v0 }
  0xe3   : > { %2688 = vmatpush3.bf16.msra.mxu0 %v2687_v25  ;;  %v1404_v25 = vld [vmem:[#allocation6 + $0xa0] sm:$0xff] }
  0xe4   : > { %2689 = vmatprep.subr.bf16.mxu0 %v2979_v19 }
  0xe7   : > { %2691 = vmatpush3.bf16.msra.mxu0 %v2690_v28  ;;  %v1407_v28 = vld [vmem:[#allocation6 + $0xb8] sm:$0xff] }
  0xe8   : > { %2692 = vmatprep.subr.bf16.mxu0 %v2979_v19 }
  0xeb   : > { %2694 = vmatpush3.bf16.msra.mxu0 %v2693_v37  ;;  %v1409_v37 = vld [vmem:[#allocation6 + $0xc8] sm:$0xff] }
  0xec   : > { %2695 = vmatprep.subr.bf16.mxu0 %v2979_v19  ;;  %v2717_v38 = vpack.c.bf16 %v1409_v37, %v1408_v36  ;;  %v1903_v36 = vld [vmem:[#allocation6 + $0x1d8] sm:$0xff] }
  0xef   : > { %2697 = vmatpush3.bf16.msra.mxu0 %v2696_v40  ;;  %v1411_v40 = vld [vmem:[#allocation6 + $0xd8] sm:$0xff] }
  0xf0   : > { %2698 = vmatprep.subr.bf16.mxu0 %v2979_v19 }
 0x151   : > { %v756_v41 = vpop.f32.mrb[0].mxu0 }
 0x152   : > { %v757_v48 = vadd.f32 %v756_v41, %v507_v46  ;;  %v758_v49 = vpop.f32.mrb[1].mxu0  ;;  %v2699_v46 = vpack.c.bf16 %v1167_v45, %v1166_v43  ;;  %v1169_v41 = vld [vmem:[#allocation6 + $0x78] sm:$0xff]  ;;  %v2720_v43 = vpack.c.bf16 %v1411_v40, %v1410_v39  ;;  %v1412_v45 = vld [vmem:[#allocation6 + $0xe0] sm:$0xff]  ;;  %v1905_v39 = vld [vmem:[#allocation6 + $0x1e8] sm:$0xff] }
 0x153   : > { %v614_v50 = vpop.f32.mrb[0].mxu1  ;;  %v759_v12 = vadd.f32 %v758_v49, %v511_v9 }
 0x154   : > { %v615_v51 = vadd.f32 %v614_v50, %v491_v47  ;;  %v616_v52 = vpop.f32.mrb[1].mxu1  ;;  %2274 = vmatpush3.xpose.msra.mxu1 %v757_v48  ;;  %v1168_v47 = vld [vmem:[#allocation6 + $0x70] sm:$0xff]  ;;  %2700 = vmatpush3.bf16.msra.mxu0 %v2699_v46  ;;  %v1413_v46 = vld [vmem:[#allocation6 + $0xe8] sm:$0xff] }
 0x155   : > { %2278 = vmatprep.subr.mxu1 %v2977_v0  ;;  %v617_v14 = vadd.f32 %v616_v52, %v495_v10  ;;  %v2702_v48 = vpack.c.bf16 %v1169_v41, %v1168_v47  ;;  %2701 = vmatprep.subr.bf16.mxu0 %v2979_v19  ;;  %v2723_v47 = vpack.c.bf16 %v1413_v46, %v1412_v45  ;;  %v1414_v41 = vld [vmem:[#allocation6 + $0xf0] sm:$0xff]  ;;  %v1907_v45 = vld [vmem:[#allocation6 + $0x1f8] sm:$0xff] }
 0x157   : > { %2276 = vmatmul.mubr.f32.vlgmr.msra.gmra.mrb[8].mxu1 %v615_v51 }
 0x158   : > { %2280 = vmatprep.mubr.msk.f32.mxu1 %vm2978_vm0, %v2977_v0  ;;  %2703 = vmatpush3.bf16.msra.mxu0 %v2702_v48  ;;  %v1415_v48 = vld [vmem:[#allocation6 + $0xf8] sm:$0xff] }
 0x159   : > { %2704 = vmatprep.subr.bf16.mxu0 %v2979_v19 }
 0x173   : > { %v3179_v53 = vpop.f32.mrb[2].mxu1 }
 0x174   : > { %v3181_v54 = vpop.f32.mrb[3].mxu1 }
 0x193   : > { %v3183_v55 = vpop.f32.mrb[4].mxu1 }
 0x194   : > { %v3185_v56 = vpop.f32.mrb[5].mxu1 }
 0x1ac   : > { %v898_v1 = vpop.f32.mrb[2].mxu0 }
 0x1ad   : > { %v900_v2 = vpop.f32.mrb[3].mxu0  ;;  %v899_v3 = vadd.f32 %v898_v1, %v523_v63 }
 0x1ae   : > { %v901_v15 = vadd.f32 %v900_v2, %v527_v13  ;;  %v518_v13 = vsub.s32 7, %v3165_v42 }
 0x1af   : > { %2279 = vmatpush3.msra.mxu1 %v899_v3 }
 0x1b0   : > { %2318 = vmatprep.subr.mxu1 %v2977_v0 }
 0x1b3   : > { %v3187_v57 = vpop.f32.mrb[6].mxu1 }
 0x1b4   : > { %v3189_v58 = vpop.f32.mrb[7].mxu1 }
 0x22a   : > { %v1064_v59 = vpop.f32.mrb[8].mxu1 }
 0x22b   : > { %v2277_v60 = vpop.f32.mrb[9].mxu1  ;;  %v1069_v61 = vsel %vm1068_vm1, %v1064_v59, -inf }
 0x22c   : > { %1070 = vmax.xlane.f32.xlu0 %v1069_v61  ;;  %v498_v60 = vsub.s32 2, %v3165_v42 }
 0x22e   : > { %v499_v63 = vrot.slane %v3171_v44, %v498_v60  ;;  %v531_v3 = vrot.slane %v3195_v62, %v498_v60  ;;  %v1646_v60 = vld [vmem:[#allocation6 + $0x100] sm:$0xff] }
 0x230   : > { %v970_v7 = vadd.f32 %v3187_v57, %v531_v3 }
 0x2b9   : > { %v1071_v4 = vpop.xlane.xlu0 %1070 }
 0x2ba   : > { %v1072_v5 = vsub.f32 %v1064_v59, %v1071_v4  ;;  %v514_v59 = vsub.s32 6, %v3165_v42 }
 0x2bc   : > { %v1073_v6 = vmul.f32 1.442695, %v1072_v5  ;;  %v515_v61 = vrot.slane %v3171_v44, %v514_v59 }
 0x2be   : > { %2853 = vpow2.f32 %v1073_v6  ;;  %v828_v2 = vadd.f32 %v3183_v55, %v515_v61  ;;  %v686_v6 = vadd.f32 %v3179_v53, %v499_v63  ;;  %v1647_v61 = vld [vmem:[#allocation6 + $0x108] sm:$0xff] }
 0x2bf   : > { %v2729_v3 = vpack.c.bf16 %v1647_v61, %v1646_v60  ;;  %v1987_v61 = vld [vmem:[#allocation8 + $0x30] sm:$0xff] }
 0x2c8   : > { %v2854_v11 = vpop.eup %2853 }
 0x2c9   : > { %2281 = vmatmul.mubr.msk.f32.vlgmr.msra.gmra.mrb[10].mxu1 %vm1068_vm1, %v2854_v11  ;;  %v1075_v34 = vsel %vm1068_vm1, %v2854_v11, 0.0 }
 0x2ca   : > { %2319 = vmatpush3.xpose.msra.mxu1 %v759_v12  ;;  %2320 = vmatprep.mubr.msk.f32.mxu1 %vm2978_vm0, %v2977_v0 }
 0x2cb   : > { %2323 = vmatprep.subr.mxu1 %v2977_v0 }
 0x2cd   : > { %2321 = vmatmul.mubr.f32.vlgmr.msra.gmra.mrb[12].mxu1 %v617_v14  ;;  %v502_v14 = vsub.s32 3, %v3165_v42 }
 0x2ce   : > { %2324 = vmatpush3.msra.mxu1 %v901_v15  ;;  %2325 = vmatprep.mubr.msk.f32.mxu1 %vm2978_vm0, %v2977_v0  ;;  %v519_v15 = vrot.slane %v3171_v44, %v518_v13 }
 0x2cf   : > { %2363 = vmatprep.subr.mxu1 %v2977_v0  ;;  %v503_v16 = vrot.slane %v3171_v44, %v502_v14  ;;  %v535_v20 = vrot.slane %v3195_v62, %v502_v14  ;;  %v1400_v44 = vld [vmem:[#allocation6 + $0x80] sm:$0xff]  ;;  %v1402_v62 = vld [vmem:[#allocation6 + $0x90] sm:$0xff] }
 0x2d0   : > { %v830_v18 = vadd.f32 %v3185_v56, %v519_v15  ;;  %v1401_v56 = vld [vmem:[#allocation6 + $0x88] sm:$0xff]  ;;  %v1656_v14 = vld [vmem:[#allocation6 + $0x150] sm:$0xff]  ;;  %v1657_v15 = vld [vmem:[#allocation6 + $0x158] sm:$0xff] }
 0x2d1   : > { %v688_v22 = vadd.f32 %v3181_v54, %v503_v16  ;;  %v972_v42 = vadd.f32 %v3189_v58, %v535_v20  ;;  %v2705_v23 = vpack.c.bf16 %v1401_v56, %v1400_v44  ;;  %v2708_v54 = vpack.c.bf16 %v1403_v24, %v1402_v62  ;;  %v1659_v20 = vld [vmem:[#allocation6 + $0x168] sm:$0xff]  ;;  %v1892_v56 = vld [vmem:[#allocation6 + $0x180] sm:$0xff] }
 0x2d2   : > { %v2711_v58 = vpack.c.bf16 %v1405_v26, %v1404_v25  ;;  %v1893_v62 = vld [vmem:[#allocation6 + $0x188] sm:$0xff]  ;;  %v1894_v25 = vld [vmem:[#allocation6 + $0x190] sm:$0xff]  ;;  %v1895_v26 = vld [vmem:[#allocation6 + $0x198] sm:$0xff] }
 0x2d3   : > { %v2753_v24 = vpack.c.bf16 %v1893_v62, %v1892_v56 }
 0x39c   : > { %v1147_v29 = vpop.f32.mrb[10].mxu1 }
 0x39d   : > { %v2282_v30 = vpop.f32.mrb[11].mxu1 }
 0x3a0   : > { %v1311_v31 = vpop.f32.mrb[12].mxu1 }
 0x3a1   : > { %v2322_v32 = vpop.f32.mrb[13].mxu1  ;;  %v1315_v33 = vsel %vm1068_vm1, %v1311_v31, -inf }
 0x3a2   : > { %1316 = vmax.xlane.f32.xlu0 %v1315_v33 }
 0x3a6   : > { %1076 = vadd.xlane.f32.xlu0 %v1075_v34 }
 0x42f   : > { %v1317_v49 = vpop.xlane.xlu0 %1316 }
 0x430   : > { %v1318_v50 = vsub.f32 %v1311_v31, %v1317_v49  ;;  %v2726_v49 = vpack.c.bf16 %v1415_v48, %v1414_v41  ;;  %v1982_v41 = vld [vmem:[#allocation8 + $0x8] sm:$0xff]  ;;  %v1983_v48 = vld [vmem:[#allocation8 + $0x10] sm:$0xff] }
 0x432   : > { %v1319_v51 = vmul.f32 1.442695, %v1318_v50 }
 0x433   : > { %v1077_v52 = vpop.xlane.xlu0 %1076 }
 0x434   : > { %2855 = vpow2.f32 %v1319_v51 }
 0x435   : > { %2857 = vrcp.f32 %v1077_v52 }
 0x43e   : > { %v3226_v1 = vpop.eup %2855 }
 0x43f   : > { %v2858_v4 = vpop.eup %2857  ;;  %2326 = vmatmul.mubr.msk.f32.vlgmr.msra.gmra.mrb[14].mxu1 %vm1068_vm1, %v3226_v1  ;;  %v1321_v35 = vsel %vm1068_vm1, %v3226_v1, 0.0 }
 0x440   : > { %2364 = vmatpush3.xpose.msra.mxu1 %v828_v2  ;;  %v1152_v5 = vmul.f32 %v2858_v4, %v1147_v29  ;;  %2365 = vmatprep.mubr.msk.f32.mxu1 %vm2978_vm0, %v2977_v0  ;;  %v2714_v29 = vpack.c.bf16 %v1407_v28, %v1406_v27  ;;  %v1896_v27 = vld [vmem:[#allocation6 + $0x1a0] sm:$0xff]  ;;  %v1897_v28 = vld [vmem:[#allocation6 + $0x1a8] sm:$0xff] }
 0x441   : > { %2368 = vmatprep.subr.mxu1 %v2977_v0 }
 0x442   : > { %2316 = vmatmul.mubr.f32.vlgmr.msra.gmra.mrb[4].mxu0 %v1152_v5  ;;  %v1648_v5 = vld [vmem:[#allocation6 + $0x110] sm:$0xff] }
 0x443   : > { %2366 = vmatmul.mubr.f32.vlgmr.msra.gmra.mrb[16].mxu1 %v686_v6  ;;  %2360 = vmatprep.mubr.msk.f32.mxu0 %vm2978_vm0, %v2977_v0  ;;  %v1649_v6 = vld [vmem:[#allocation6 + $0x118] sm:$0xff] }
 0x444   : > { %2369 = vmatpush3.msra.mxu1 %v970_v7  ;;  %2370 = vmatprep.mubr.msk.f32.mxu1 %vm2978_vm0, %v2977_v0  ;;  %v2732_v7 = vpack.c.bf16 %v1649_v6, %v1648_v5  ;;  %v1991_v5 = vld [vmem:[#allocation8 + $0x50] sm:$0xff]  ;;  %v1992_v6 = vld [vmem:[#allocation8 + $0x58] sm:$0xff] }
 0x445   : > { %2408 = vmatprep.subr.mxu1 %v2977_v0  ;;  %2706 = vmatpush3.bf16.msra.mxu0 %v2705_v23 }
 0x446   : > { %2707 = vmatprep.subr.bf16.mxu0 %v2979_v19 }
 0x449   : > { %2709 = vmatpush3.bf16.msra.mxu0 %v2708_v54 }
 0x44a   : > { %2710 = vmatprep.subr.bf16.mxu0 %v2979_v19 }
 0x44d   : > { %2712 = vmatpush3.bf16.msra.mxu0 %v2711_v58  ;;  %v2756_v58 = vpack.c.bf16 %v1895_v26, %v1894_v25 }
 0x44e   : > { %2713 = vmatprep.subr.bf16.mxu0 %v2979_v19 }
 0x451   : > { %2715 = vmatpush3.bf16.msra.mxu0 %v2714_v29  ;;  %v2759_v29 = vpack.c.bf16 %v1897_v28, %v1896_v27 }
 0x452   : > { %2716 = vmatprep.subr.bf16.mxu0 %v2979_v19 }
 0x455   : > { %2718 = vmatpush3.bf16.msra.mxu0 %v2717_v38  ;;  %v1904_v38 = vld [vmem:[#allocation6 + $0x1e0] sm:$0xff] }
 0x456   : > { %2719 = vmatprep.subr.bf16.mxu0 %v2979_v19  ;;  %v2771_v40 = vpack.c.bf16 %v1905_v39, %v1904_v38 }
 0x459   : > { %2721 = vmatpush3.bf16.msra.mxu0 %v2720_v43  ;;  %v1906_v43 = vld [vmem:[#allocation6 + $0x1f0] sm:$0xff] }
 0x45a   : > { %2722 = vmatprep.subr.bf16.mxu0 %v2979_v19  ;;  %v2774_v46 = vpack.c.bf16 %v1907_v45, %v1906_v43 }
 0x45d   : > { %2724 = vmatpush3.bf16.msra.mxu0 %v2723_v47  ;;  %v1981_v47 = vld [vmem:[#allocation8] sm:$0xff] }
 0x45e   : > { %2725 = vmatprep.subr.bf16.mxu0 %v2979_v19 }
 0x461   : > { %2727 = vmatpush3.bf16.msra.mxu0 %v2726_v49  ;;  %v2777_v49 = vpack.c.bf16 %v1982_v41, %v1981_v47 }
 0x462   : > { %2728 = vmatprep.subr.bf16.mxu0 %v2979_v19 }
 0x512   : > { %v3242_v55 = vpop.f32.mrb[14].mxu1 }
 0x513   : > { %v2327_v8 = vpop.f32.mrb[15].mxu1 }
 0x514   : > { %v1650_v8 = vld [vmem:[#allocation6 + $0x120] sm:$0xff] }
 0x516   : > { %v1557_v9 = vpop.f32.mrb[16].mxu1 }
 0x517   : > { %v2367_v53 = vpop.f32.mrb[17].mxu1  ;;  %v1561_v10 = vsel %vm1068_vm1, %v1557_v9, -inf }
 0x518   : > { %1562 = vmax.xlane.f32.xlu1 %v1561_v10  ;;  %v1653_v10 = vld [vmem:[#allocation6 + $0x138] sm:$0xff] }
 0x5a5   : > { %v1563_v57 = vpop.xlane.xlu1 %1562 }
 0x5a6   : > { %v1564_v11 = vsub.f32 %v1557_v9, %v1563_v57  ;;  %v1651_v9 = vld [vmem:[#allocation6 + $0x128] sm:$0xff] }
 0x5a7   : > { %v2735_v53 = vpack.c.bf16 %v1651_v9, %v1650_v8  ;;  %v1993_v8 = vld [vmem:[#allocation8 + $0x60] sm:$0xff]  ;;  %v1994_v9 = vld [vmem:[#allocation8 + $0x68] sm:$0xff] }
 0x5a8   : > { %v1565_v12 = vmul.f32 1.442695, %v1564_v11  ;;  %v1654_v11 = vld [vmem:[#allocation6 + $0x140] sm:$0xff] }
 0x5aa   : > { %2859 = vpow2.f32 %v1565_v12  ;;  %v1655_v12 = vld [vmem:[#allocation6 + $0x148] sm:$0xff] }
 0x5ab   : > { %v2741_v13 = vpack.c.bf16 %v1655_v12, %v1654_v11 }
 0x5b4   : > { %v2860_v17 = vpop.eup %2859 }
 0x5b5   : > { %2371 = vmatmul.mubr.msk.f32.vlgmr.msra.gmra.mrb[18].mxu1 %vm1068_vm1, %v2860_v17  ;;  %v1567_v21 = vsel %vm1068_vm1, %v2860_v17, 0.0  ;;  %v2744_v17 = vpack.c.bf16 %v1657_v15, %v1656_v14  ;;  %v1996_v14 = vld [vmem:[#allocation8 + $0x78] sm:$0xff] }
 0x5b6   : > { %2409 = vmatpush3.xpose.msra.mxu1 %v830_v18  ;;  %1568 = vadd.xlane.f32.xlu0 %v1567_v21  ;;  %v1658_v18 = vld [vmem:[#allocation6 + $0x160] sm:$0xff] }
 0x5b7   : > { %2410 = vmatprep.mubr.msk.f32.mxu1 %vm2978_vm0, %v2977_v0  ;;  %2413 = vmatprep.subr.mxu1 %v2977_v0  ;;  %v2747_v21 = vpack.c.bf16 %v1659_v20, %v1658_v18 }
 0x5b9   : > { %2411 = vmatmul.mubr.f32.vlgmr.msra.gmra.mrb[20].mxu1 %v688_v22  ;;  %v1660_v22 = vld [vmem:[#allocation6 + $0x170] sm:$0xff] }
 0x5ba   : > { %2414 = vmatpush3.msra.mxu1 %v972_v42  ;;  %2415 = vmatprep.mubr.msk.f32.mxu1 %vm2978_vm0, %v2977_v0  ;;  %v1661_v42 = vld [vmem:[#allocation6 + $0x178] sm:$0xff] }
 0x5bb   : > { %2776 = vmatprep.subr.bf16.mxu1 %v2979_v19  ;;  %v2750_v44 = vpack.c.bf16 %v1661_v42, %v1660_v22 }
 0x643   : > { %v1569_v16 = vpop.xlane.xlu0 %1568 }
 0x688   : > { %v3265_v30 = vpop.f32.mrb[18].mxu1 }
 0x689   : > { %v2372_v31 = vpop.f32.mrb[19].mxu1 }
 0x68a   : > { %v1898_v31 = vld [vmem:[#allocation6 + $0x1b0] sm:$0xff] }
 0x68c   : > { %v1803_v32 = vpop.f32.mrb[20].mxu1 }
 0x68d   : > { %v2412_v33 = vpop.f32.mrb[21].mxu1  ;;  %v1807_v34 = vsel %vm1068_vm1, %v1803_v32, -inf }
 0x68e   : > { %1808 = vmax.xlane.f32.xlu1 %v1807_v34  ;;  %v1900_v33 = vld [vmem:[#allocation6 + $0x1c0] sm:$0xff]  ;;  %v1901_v34 = vld [vmem:[#allocation6 + $0x1c8] sm:$0xff] }
 0x692   : > { %1322 = vadd.xlane.f32.xlu1 %v1321_v35  ;;  %v2765_v35 = vpack.c.bf16 %v1901_v34, %v1900_v33 }
 0x71b   : > { %v1809_v50 = vpop.xlane.xlu1 %1808 }
 0x71c   : > { %v1810_v51 = vsub.f32 %v1803_v32, %v1809_v50  ;;  %v1984_v50 = vld [vmem:[#allocation8 + $0x18] sm:$0xff] }
 0x71e   : > { %v1811_v52 = vmul.f32 1.442695, %v1810_v51  ;;  %v2780_v51 = vpack.c.bf16 %v1984_v50, %v1983_v48 }
 0x71f   : > { %v1323_v59 = vpop.xlane.xlu1 %1322 }
 0x720   : > { %2861 = vpow2.f32 %v1811_v52  ;;  %v1985_v52 = vld [vmem:[#allocation8 + $0x20] sm:$0xff] }
 0x721   : > { %2863 = vrcp.f32 %v1323_v59  ;;  %v1986_v59 = vld [vmem:[#allocation8 + $0x28] sm:$0xff] }
 0x722   : > { %2865 = vrcp.f32 %v1569_v16  ;;  %v2783_v60 = vpack.c.bf16 %v1986_v59, %v1985_v52  ;;  %v2165_v16 = vld [vmem:[%s3322_s4] ss:$0 sm:$0xff] }
 0x72a   : > { %v2862_v63 = vpop.eup %2861 }
 0x72b   : > { %v2864_v1 = vpop.eup %2863  ;;  %2416 = vmatmul.mubr.msk.f32.vlgmr.msra.gmra.mrb[22].mxu1 %vm1068_vm1, %v2862_v63  ;;  %v1813_v2 = vsel %vm1068_vm1, %v2862_v63, 0.0  ;;  %v1988_v63 = vld [vmem:[#allocation8 + $0x38] sm:$0xff] }
 0x72c   : > { %1814 = vadd.xlane.f32.xlu1 %v1813_v2  ;;  %v1398_v4 = vmul.f32 %v2864_v1, %v3242_v55  ;;  %2485 = vmatprep.mubr.msk.f32.mxu1 %vm2978_vm0, %v2977_v0  ;;  %v1652_v55 = vld [vmem:[#allocation6 + $0x130] sm:$0xff]  ;;  %v2866_v23 = vpop.eup %2865  ;;  %v2786_v1 = vpack.c.bf16 %v1988_v63, %v1987_v61  ;;  %v1989_v2 = vld [vmem:[#allocation8 + $0x40] sm:$0xff] }
 0x72d   : > { %v2738_v57 = vpack.c.bf16 %v1653_v10, %v1652_v55  ;;  %v1644_v54 = vmul.f32 %v2866_v23, %v3265_v30  ;;  %v1899_v30 = vld [vmem:[#allocation6 + $0x1b8] sm:$0xff]  ;;  %2778 = vmatpush3.bf16.msra.mxu1 %v2777_v49 }
 0x72e   : > { %2361 = vmatmul.mubr.f32.vlgmr.msra.gmra.mrb[4].mxu0 %v1398_v4  ;;  %v2762_v32 = vpack.c.bf16 %v1899_v30, %v1898_v31  ;;  %2779 = vmatprep.subr.bf16.mxu1 %v2979_v19 }
 0x72f   : > { %2730 = vmatpush3.bf16.msra.mxu0 %v2729_v3  ;;  %2405 = vmatprep.mubr.msk.f32.mxu0 %vm2978_vm0, %v2977_v0  ;;  %v1990_v3 = vld [vmem:[#allocation8 + $0x48] sm:$0xff] }
 0x730   : > { %2731 = vmatprep.subr.bf16.mxu0 %v2979_v19  ;;  %v2789_v4 = vpack.c.bf16 %v1990_v3, %v1989_v2 }
 0x731   : > { %2781 = vmatpush3.bf16.msra.mxu1 %v2780_v51 }
 0x732   : > { %2782 = vmatprep.subr.bf16.mxu1 %v2979_v19 }
 0x733   : > { %2733 = vmatpush3.bf16.msra.mxu0 %v2732_v7  ;;  %v2792_v7 = vpack.c.bf16 %v1992_v6, %v1991_v5 }
 0x734   : > { %2734 = vmatprep.subr.bf16.mxu0 %v2979_v19 }
 0x735   : > { %2784 = vmatpush3.bf16.msra.mxu1 %v2783_v60 }
 0x736   : > { %2785 = vmatprep.subr.bf16.mxu1 %v2979_v19 }
 0x737   : > { %2736 = vmatpush3.bf16.msra.mxu0 %v2735_v53  ;;  %v2795_v53 = vpack.c.bf16 %v1994_v9, %v1993_v8 }
 0x738   : > { %2737 = vmatprep.subr.bf16.mxu0 %v2979_v19 }
 0x739   : > { %2787 = vmatpush3.bf16.msra.mxu1 %v2786_v1 }
 0x73a   : > { %2788 = vmatprep.subr.bf16.mxu1 %v2979_v19 }
 0x73b   : > { %2739 = vmatpush3.bf16.msra.mxu0 %v2738_v57 }
 0x73c   : > { %2740 = vmatprep.subr.bf16.mxu0 %v2979_v19 }
 0x73d   : > { %2790 = vmatpush3.bf16.msra.mxu1 %v2789_v4 }
 0x73e   : > { %2791 = vmatprep.subr.bf16.mxu1 %v2979_v19 }
 0x73f   : > { %2742 = vmatpush3.bf16.msra.mxu0 %v2741_v13  ;;  %v1995_v13 = vld [vmem:[#allocation8 + $0x70] sm:$0xff] }
 0x740   : > { %2743 = vmatprep.subr.bf16.mxu0 %v2979_v19  ;;  %v2798_v15 = vpack.c.bf16 %v1996_v14, %v1995_v13 }
 0x741   : > { %2793 = vmatpush3.bf16.msra.mxu1 %v2792_v7 }
 0x742   : > { %2794 = vmatprep.subr.bf16.mxu1 %v2979_v19 }
 0x743   : > { %2745 = vmatpush3.bf16.msra.mxu0 %v2744_v17  ;;  %v2869_v17 = vld [vmem:[%s3145_s12] sm:$0xff] }
 0x744   : > { %2746 = vmatprep.subr.bf16.mxu0 %v2979_v19  ;;  %v993_v18 = vadd.f32 %v2869_v17, %v2165_v16 }
 0x745   : > { %2796 = vmatpush3.bf16.msra.mxu1 %v2795_v53 }
 0x746   : > { %2797 = vmatprep.subr.bf16.mxu1 %v2979_v19 }
 0x747   : > { %2748 = vmatpush3.bf16.msra.mxu0 %v2747_v21 }
 0x748   : > { %2749 = vmatprep.subr.bf16.mxu0 %v2979_v19 }
 0x749   : > { %2799 = vmatpush3.bf16.msra.mxu1 %v2798_v15 }
 0x74b   : > { %2751 = vmatpush3.bf16.msra.mxu0 %v2750_v44 }
 0x74c   : > { %2752 = vmatprep.subr.bf16.mxu0 %v2979_v19 }
 0x74e   : > { %2406 = vmatmul.mubr.f32.vlgmr.msra.gmra.mrb[4].mxu0 %v1644_v54 }
 0x74f   : > { %2754 = vmatpush3.bf16.msra.mxu0 %v2753_v24  ;;  %2450 = vmatprep.mubr.msk.f32.mxu0 %vm2978_vm0, %v2977_v0  ;;  %v1902_v0 = vld [vmem:[#allocation6 + $0x1d0] sm:$0xff] }
 0x750   : > { %2755 = vmatprep.subr.bf16.mxu0 %v2979_v19  ;;  %v2768_v37 = vpack.c.bf16 %v1903_v36, %v1902_v0 }
 0x753   : > { %2757 = vmatpush3.bf16.msra.mxu0 %v2756_v58 }
 0x754   : > { %2758 = vmatprep.subr.bf16.mxu0 %v2979_v19 }
 0x757   : > { %2760 = vmatpush3.bf16.msra.mxu0 %v2759_v29 }
 0x758   : > { %2761 = vmatprep.subr.bf16.mxu0 %v2979_v19 }
 0x75b   : > { %2763 = vmatpush3.bf16.msra.mxu0 %v2762_v32 }
 0x75c   : > { %2764 = vmatprep.subr.bf16.mxu0 %v2979_v19 }
 0x75f   : > { %2766 = vmatpush3.bf16.msra.mxu0 %v2765_v35 }
 0x760   : > { %2767 = vmatprep.subr.bf16.mxu0 %v2979_v19 }
 0x763   : > { %2769 = vmatpush3.bf16.msra.mxu0 %v2768_v37 }
 0x764   : > { %2770 = vmatprep.subr.bf16.mxu0 %v2979_v19 }
 0x767   : > { %2772 = vmatpush3.bf16.msra.mxu0 %v2771_v40 }
 0x768   : > { %2773 = vmatprep.subr.bf16.mxu0 %v2979_v19 }
 0x76b   : > { %2775 = vmatpush3.bf16.msra.mxu0 %v2774_v46 }
 0x7b9   : > { %v1815_v55 = vpop.xlane.xlu1 %1814 }
 0x7ba   : > { %2867 = vrcp.f32 %v1815_v55 }
 0x7c4   : > { %v2868_v10 = vpop.eup %2867 }
 0x7fe   : > { %v1885_v57 = vpop.f32.mrb[22].mxu1 }
 0x7ff   : > { %v1890_v11 = vmul.f32 %v2868_v10, %v1885_v57  ;;  %v2417_v12 = vpop.f32.mrb[23].mxu1 }
 0x801   : > { %2451 = vmatmul.mubr.f32.vlgmr.msra.gmra.mrb[4].mxu0 %v1890_v11 }
 0x8d4   : > { %v1974_v20 = vpop.f32.mrb[4].mxu0 }
 0x8d5   : > { %v2800_v19 = vadd.f32 %v1974_v20, %v993_v18  ;;  %v2452_v21 = vpop.f32.mrb[5].mxu0 }
 0x8d7   : > { %2486 = vmatmul.mubr.f32.vlgmr.msra.gmra.mrb[24].mxu1 %v2800_v19 }
 0x9aa   : > { %v2063_v22 = vpop.f32.mrb[24].mxu1 }
 0x9ab   : > { %v2064_v42 = vadd.f32 %v2800_v19, %v2063_v22  ;;  %v2487_v44 = vpop.f32.mrb[25].mxu1 }
 0x9ad   : > { %2067 = vst [vmem:[%s290_s15] sm:$0xff] %v2064_v42 }
 0x9ae PF: > { %s18_s21 = sadd.s32 1, %s2968_s21  }
 0x9af   : > { %p15_p13 = scmp.ge.s32.totalorder %s18_s21, 4  }
 0x9b1   :  { %17 = sbr.rel (!%p15_p13) target bundleno = 2 (0x2), region = 87 }
 0x9b8   :  { %2087 = vsyncpa [#allocation5], 1 }
 0x9b9   :  { %2089 = vsyncpa [#allocation5 + $0x1], 1 }
 0x9ba   :  { %2090 = vsyncpa [#allocation7], 1 }

</bundles_post_ra>
